<compile_context>
chip_gen: v7x
topology: tpu7x:2x2x1
jax: 0.10.0
libtpu: 0.0.40
codegen_flags: <defaults>
</compile_context>

<pallas_src>
import functools
import math

import jax
import jax.numpy as jnp
from jax import lax
from jax.experimental import pallas as pl
from jax.experimental.pallas import tpu as pltpu

_NEG_INIT = -1.0e30   # finite "-inf" for the online-softmax running max


# --------------------------------------------------------------------------- kernel
def _sab_kernel(x_ref, wq_ref, bq_ref, wk_ref, bk_ref, wv_ref, bv_ref,
                wo_ref, bo_ref, o_ref, k_scr, v_scr, *,
                num_heads_eff, dim_split, tq, kv_chunk, proj_chunk,
                tiles_per_split, n_pad, n_valid):
    """Grid = (batch, query-split, query-tile); one step = one (tq, D) query tile."""
    f32, bf16 = jnp.float32, jnp.bfloat16
    H, d = num_heads_eff, dim_split
    needs_mask = n_valid < n_pad          # static: padded keys must be masked out
    qi = pl.program_id(2)
    x2 = x_ref.at[0]                      # (n_pad, D_in) bf16 Ref view

    # ---- once per (batch, split): project K/V for the whole set into head-major
    #      VMEM scratch, chunked over rows so only (proj_chunk, D) temporaries are
    #      live at a time (bounds the qi==0 prologue working set). ----
    @pl.when(qi == 0)
    def _():
        n_chunks = n_pad // proj_chunk

        def proj_body(c, carry):
            rs = pl.multiple_of(c * proj_chunk, proj_chunk)
            xc = x2[pl.ds(rs, proj_chunk), :]                        # (PC, D_in) bf16
            kc = (jnp.dot(xc, wk_ref[...], preferred_element_type=f32)
                  + bk_ref[0]).astype(bf16)
            vc = (jnp.dot(xc, wv_ref[...], preferred_element_type=f32)
                  + bv_ref[0]).astype(bf16)
            # Head split via H static slices (prologue-only, amortized over all query
            # tiles).  A single (PC,H,d)->(H,PC,d) regroup (pltpu.einshape) would be
            # equivalent; explicit slices are kept for robust lowering when d < 128.
            for h in range(H):
                k_scr[h, pl.ds(rs, proj_chunk), :] = kc[:, h * d:(h + 1) * d]
                v_scr[h, pl.ds(rs, proj_chunk), :] = vc[:, h * d:(h + 1) * d]
            return carry

        lax.fori_loop(0, n_chunks, proj_body, 0, unroll=n_chunks <= 2)

    # ---- per query tile ----
    tile_idx = pl.program_id(1) * tiles_per_split + qi
    qs = pl.multiple_of(tile_idx * tq, tq)
    x_tile = x2[pl.ds(qs, tq), :]                                    # (tq, D_in) bf16

    # Q projection; the 1/sqrt(dim_V) softmax scale is already folded into wq/bq.
    q = jnp.dot(x_tile, wq_ref[...], preferred_element_type=f32) + bq_ref[0]
    qh = jnp.stack([q[:, h * d:(h + 1) * d] for h in range(H)],
                   axis=0).astype(bf16)                              # (H, tq, d)

    # ---- flash-style online softmax over KV chunks: live score/prob tiles are
    #      (H, tq, kv_chunk) instead of (H, tq, n_pad). ----
    num_kv = n_pad // kv_chunk

    def kv_body(c, carry):
        m, l, acc = carry
        ks = pl.multiple_of(c * kv_chunk, kv_chunk)
        k_c = k_scr[:, pl.ds(ks, kv_chunk), :]                       # (H, CK, d) bf16
        v_c = v_scr[:, pl.ds(ks, kv_chunk), :]
        s = jnp.einsum('hqd,hkd->hqk', qh, k_c,
                       preferred_element_type=f32)                   # (H, tq, CK) f32
        m_new = jnp.maximum(m, jnp.max(s, axis=-1, keepdims=True))
        alpha = jnp.exp(m - m_new)
        # TODO(synk): on v6e/v7x the exp could run in bf16 for ~2x EUP throughput;
        # kept f32 so the same kernel also lowers on v5e (no bf16 EUP/VPU).
        p = jnp.exp(s - m_new)
        if needs_mask:
            key_idx = ks + lax.broadcasted_iota(jnp.int32, s.shape, 2)
            p = jnp.where(key_idx < n_valid, p, 0.0)                 # drop padded keys
        l_new = alpha * l + jnp.sum(p, axis=-1, keepdims=True)
        acc_new = alpha * acc + jnp.einsum('hqk,hkd->hqd', p.astype(bf16), v_c,
                                           preferred_element_type=f32)
        return m_new, l_new, acc_new

    m0 = jnp.full((H, tq, 1), _NEG_INIT, f32)
    l0 = jnp.zeros((H, tq, 1), f32)
    a0 = jnp.zeros((H, tq, d), f32)
    _, l, acc = lax.fori_loop(0, num_kv, kv_body, (m0, l0, a0),
                              unroll=num_kv <= 2)
    attn = acc * pl.reciprocal(l, approx=True)                       # (H, tq, d)

    # residual: O = X + concat_h(A_h V_h)   (feature order == head order)
    o = x_tile.astype(f32) + jnp.concatenate([attn[h] for h in range(H)], axis=-1)
    o_proj = jnp.dot(o.astype(bf16), wo_ref[...], preferred_element_type=f32) + bo_ref[0]
    o = o + jnp.maximum(o_proj, 0.0)                                 # O + relu(fc_o(O))
    o_ref[0] = o.astype(o_ref.dtype)


# ----------------------------------------------------------------- sizing heuristics
def _vmem_budget_bytes():
    """Per-generation VMEM budget (~75% of per-core capacity, conservative fallback)."""
    cap = 64 * 1024 * 1024                 # v7x per-core capacity as a safe default
    try:
        info = pltpu.get_tpu_info()
        cap = int(getattr(info, "vmem_capacity_bytes", cap))
    except Exception:
        pass
    cap = min(cap, 128 * 1024 * 1024)
    return max(32 * 1024 * 1024, (cap * 3) // 4)


def _tile_candidates(n, cap):
    """Divisors of n that are <= cap and a multiple of 8 (or n itself), descending."""
    cands = [t for t in range(min(cap, n), 0, -1)
             if n % t == 0 and (t % 8 == 0 or t == n)]
    return cands or [n]


def _choose_tiles(n_pad, num_heads_eff, d_v, remaining_bytes, *, max_tq, max_ck):
    """Largest (query-tile, kv-chunk) whose per-step working set fits the budget."""
    for tq in _tile_candidates(n_pad, max_tq):
        for ck in _tile_candidates(n_pad, max_ck):
            # s(f32) + p(f32) + p(bf16) per chunk, plus q/qh/acc/o/output-buffer tiles.
            per_tile = num_heads_eff * tq * ck * 10 + tq * d_v * 40
            if per_tile <= remaining_bytes:
                return tq, ck
    t = _tile_candidates(n_pad, 8)[-1]
    return t, t


def _choose_proj_chunk(n_pad, d_in, d_v, remaining_bytes, *, max_pc=512):
    """Row chunk for the once-per-batch K/V projection prologue."""
    for pc in _tile_candidates(n_pad, max_pc):
        if pc * (2 * d_in + 12 * d_v) <= remaining_bytes:
            return pc
    return _tile_candidates(n_pad, 8)[-1]


# ------------------------------------------------------------------------- wrapper
def sab_forward(x, params, num_heads, *, max_tq=None, max_ck=None):
    """x: (B, N, D_in). params: (wq, bq, wk, bk, wv, bv, wo, bo), W:(in,out), b:(1,out)."""
    B, N, D_in = x.shape
    wq, bq, wk, bk, wv, bv, wo, bo = params
    D_V = wq.shape[1]
    assert D_in == D_V, "SAB residual (input_multihead + A@V) requires dim_in == dim_out"

    dim_split = 2 ** int(round(math.log2(D_V // num_heads)))
    assert D_V % dim_split == 0, "head split must divide dim_V evenly"
    H = D_V // dim_split                   # actual number of head-chunks used
    d = dim_split

    # Pad the set dimension to a multiple of 8 (sublane granularity); padded keys are
    # masked inside the kernel and padded query rows sliced off below.
    n_pad = -(-N // 8) * 8

    # ---- VMEM budget -> tile sizes (derived per generation, not hard-coded) ----
    budget = _vmem_budget_bytes()
    default_max_tq = 256 if budget >= 72 * 1024 * 1024 else 128   # bigger tiles on 128 MiB parts
    fixed = (4 * n_pad * D_V                         # bf16 K + V scratch
             + 2 * n_pad * D_in                      # single-buffered bf16 X block
             + 2 * (3 * D_in * D_V + D_V * D_V))     # single-buffered bf16 weights
    remaining = max(budget - fixed - (2 << 20), 1 << 20)
    TQ, CK = _choose_tiles(n_pad, H, D_V, remaining,
                           max_tq=(max_tq or default_max_tq),
                           max_ck=(max_ck or 512))
    PC = _choose_proj_chunk(n_pad, D_in, D_V, remaining)
    assert n_pad % TQ == 0 and (TQ % 8 == 0 or TQ == n_pad)
    assert n_pad % CK == 0 and n_pad % PC == 0

    num_q_tiles = n_pad // TQ
    # Second "parallel" axis so v7x's 2 TensorCores both get work at small/odd batch
    # (K/V projection is redundantly recomputed per split; scratch is per-core).
    q_split = 2 if (B % 2 == 1 and num_q_tiles % 2 == 0) else 1
    tiles_per_split = num_q_tiles // q_split

    bf16, f32 = jnp.bfloat16, jnp.float32
    scale = 1.0 / math.sqrt(D_V)
    x_pad = x if n_pad == N else jnp.pad(x, ((0, 0), (0, n_pad - N), (0, 0)))
    x_bf = x_pad.astype(bf16)
    # Fold the softmax scale into the Q projection weights/bias (free at cast time).
    wq_b = (wq * scale).astype(bf16)
    bq_f = (bq * scale).astype(f32)
    wk_b, wv_b, wo_b = (w.astype(bf16) for w in (wk, wv, wo))
    bk_f, bv_f, bo_f = (b.astype(f32) for b in (bk, bv, bo))
    args = (x_bf, wq_b, bq_f, wk_b, bk_f, wv_b, bv_f, wo_b, bo_f)

    kernel = functools.partial(
        _sab_kernel, num_heads_eff=H, dim_split=d, tq=TQ, kv_chunk=CK,
        proj_chunk=PC, tiles_per_split=tiles_per_split, n_pad=n_pad, n_valid=N)

    def build(single_buffer):
        def spec(shape, index_map):
            if single_buffer:
                # Invariant-per-step inputs: no pipelining benefit, so don't hold two
                # VMEM copies (default double-buffered weights/X are fatal at large
                # D / N on v7x's 64 MiB VMEM).
                return pl.BlockSpec(shape, index_map, pipeline_mode=pl.Buffered(1))
            return pl.BlockSpec(shape, index_map)

        x_spec = spec((1, n_pad, D_in), lambda b, s, q: (b, 0, 0))
        w_spec = spec((D_in, D_V), lambda b, s, q: (0, 0))
        wo_spec = spec((D_V, D_V), lambda b, s, q: (0, 0))
        b_spec = spec((1, D_V), lambda b, s, q: (0, 0))
        return pl.pallas_call(
            kernel,
            out_shape=jax.ShapeDtypeStruct((B, n_pad, D_V), x.dtype),
            grid_spec=pltpu.PrefetchScalarGridSpec(
                num_scalar_prefetch=0,
                grid=(B, q_split, tiles_per_split),
                in_specs=[x_spec,
                          w_spec, b_spec,      # fc_q (scale pre-folded)
                          w_spec, b_spec,      # fc_k
                          w_spec, b_spec,      # fc_v
                          wo_spec, b_spec],    # fc_o
                out_specs=pl.BlockSpec(
                    (1, TQ, D_V),
                    lambda b, s, q: (b, s * tiles_per_split + q, 0)),
                scratch_shapes=[pltpu.VMEM((H, n_pad, d), bf16),    # K head-major
                                pltpu.VMEM((H, n_pad, d), bf16)],   # V head-major
            ),
            compiler_params=pltpu.CompilerParams(
                dimension_semantics=("parallel", "parallel", "arbitrary"),
                vmem_limit_bytes=budget,
            ),
        )

    try:
        out = jax.block_until_ready(build(single_buffer=True)(*args))
    except Exception:
        # pl.Buffered(1) pipeline_mode not supported by this JAX/Mosaic build:
        # fall back to default double-buffering (correct, just more VMEM).
        out = jax.block_until_ready(build(single_buffer=False)(*args))

    if n_pad != N:
        out = out[:, :N, :]
    # SAB.forward returns (O, lengths); lengths is None here.
    return out, None


# ----------------------------------------------------------- reference + param init
def sab_reference(x, params, num_heads):
    """Pure-JAX f32 replica of the PyTorch SAB forward (norm='none', lengths=None)."""
    wq, bq, wk, bk, wv, bv, wo, bo = params
    D_V = wq.shape[1]
    Q = x @ wq + bq
    K = x @ wk + bk
    V = x @ wv + bv
    d = 2 ** int(round(math.log2(D_V // num_heads)))
    H = D_V // d

    def split_heads(t):                     # torch.cat(t.split(d, 2), 0)
        return jnp.concatenate(jnp.split(t, t.shape[2] // d, axis=2), axis=0)

    Q_, K_, V_, X_ = split_heads(Q), split_heads(K), split_heads(V), split_heads(x)
    A = jax.nn.softmax(jnp.einsum('bqd,bkd->bqk', Q_, K_) / math.sqrt(D_V), axis=2)
    O = X_ + jnp.einsum('bqk,bkd->bqd', A, V_)
    O = jnp.concatenate(jnp.split(O, H, axis=0), axis=2)
    return O + jax.nn.relu(O @ wo + bo)


def init_params(key, dim_in, dim_out):
    """Deterministic Linear-layer init (uniform, PyTorch-style bounds), W stored (in, out)."""
    ks = jax.random.split(key, 8)

    def lin(kw, kb, fan_in, fan_out):
        bound = 1.0 / math.sqrt(fan_in)
        w = jax.random.uniform(kw, (fan_in, fan_out), jnp.float32, -bound, bound)
        b = jax.random.uniform(kb, (1, fan_out), jnp.float32, -bound, bound)
        return w, b

    wq, bq = lin(ks[0], ks[1], dim_in, dim_out)
    wk, bk = lin(ks[2], ks[3], dim_in, dim_out)
    wv, bv = lin(ks[4], ks[5], dim_in, dim_out)
    wo, bo = lin(ks[6], ks[7], dim_out, dim_out)
    return (wq, bq, wk, bk, wv, bv, wo, bo)


if __name__ == "__main__":
    key = jax.random.PRNGKey(0)
    k1, k2, k3, kp = jax.random.split(key, 4)

    D, H = 32, 4
    params = init_params(kp, D, D)

    def run_case(name, x, num_heads, **kw):
        out, _ = sab_forward(x, params, num_heads, **kw)
        out = jax.block_until_ready(out)
        ref = sab_reference(x, params, num_heads)
        assert out.shape == ref.shape
        assert bool(jnp.all(jnp.isfinite(out)))
        err = float(jnp.max(jnp.abs(out - ref)))
        assert err < 0.2, f"{name}: max |kernel - ref| = {err}"

    # Case 1: basic small config (B=2, N=8, D=32, 4 heads -> dim_split=8).
    x1 = jax.random.normal(k1, (2, 8, D), dtype=jnp.float32)
    run_case("base", x1, H)

    # Case 2: odd batch (B=1) -> 2-way query-split parallel axis; forced small tiles so
    # the multi-tile / multi-KV-chunk online softmax path actually executes.
    x2 = jax.random.normal(k2, (1, 32, D), dtype=jnp.float32)
    run_case("split+chunks", x2, H, max_tq=8, max_ck=8)

    # Case 3: N not a multiple of 8 -> wrapper pads the set dim, kernel masks padded keys.
    x3 = jax.random.normal(k3, (2, 12, D), dtype=jnp.float32)
    run_case("padded+masked", x3, H)

    print("KERNEL_OK")
</pallas_src>

<mosaic_0001>
module attributes {stable_mosaic.version = 11 : i64} {
  func.func @_sab_kernel(%arg0: i32, %arg1: i32, %arg2: i32, %arg3: memref<1x8x32xbf16, #tpu.memory_space<vmem>>, %arg4: memref<32x32xbf16, #tpu.memory_space<vmem>>, %arg5: memref<1x32xf32, #tpu.memory_space<vmem>>, %arg6: memref<32x32xbf16, #tpu.memory_space<vmem>>, %arg7: memref<1x32xf32, #tpu.memory_space<vmem>>, %arg8: memref<32x32xbf16, #tpu.memory_space<vmem>>, %arg9: memref<1x32xf32, #tpu.memory_space<vmem>>, %arg10: memref<32x32xbf16, #tpu.memory_space<vmem>>, %arg11: memref<1x32xf32, #tpu.memory_space<vmem>>, %arg12: memref<1x8x32xf32, #tpu.memory_space<vmem>>, %arg13: memref<4x8x8xbf16, #tpu.memory_space<vmem>>, %arg14: memref<4x8x8xbf16, #tpu.memory_space<vmem>>) attributes {dimension_semantics = [#tpu.dimension_semantics<parallel>, #tpu.dimension_semantics<parallel>, #tpu.dimension_semantics<arbitrary>], iteration_bounds = array<i64: 2, 1, 1>, scalar_prefetch = 0 : i64, scratch_operands = 2 : i64, tpu.core_type = #tpu.core_type<tc>, window_params = [{pipeline_mode = #tpu.pipeline_mode<synchronous>, transform_indices = @transform_0, window_bounds = array<i64: 1, 8, 32>}, {pipeline_mode = #tpu.pipeline_mode<synchronous>, transform_indices = @transform_1, window_bounds = array<i64: 32, 32>}, {pipeline_mode = #tpu.pipeline_mode<synchronous>, transform_indices = @transform_2, window_bounds = array<i64: 1, 32>}, {pipeline_mode = #tpu.pipeline_mode<synchronous>, transform_indices = @transform_3, window_bounds = array<i64: 32, 32>}, {pipeline_mode = #tpu.pipeline_mode<synchronous>, transform_indices = @transform_4, window_bounds = array<i64: 1, 32>}, {pipeline_mode = #tpu.pipeline_mode<synchronous>, transform_indices = @transform_5, window_bounds = array<i64: 32, 32>}, {pipeline_mode = #tpu.pipeline_mode<synchronous>, transform_indices = @transform_6, window_bounds = array<i64: 1, 32>}, {pipeline_mode = #tpu.pipeline_mode<synchronous>, transform_indices = @transform_7, window_bounds = array<i64: 32, 32>}, {pipeline_mode = #tpu.pipeline_mode<synchronous>, transform_indices = @transform_8, window_bounds = array<i64: 1, 32>}, {transform_indices = @transform_9, window_bounds = array<i64: 1, 8, 32>}]} {
    %c0_i32 = arith.constant 0 : i32
    %0 = arith.cmpi eq, %arg2, %c0_i32 : i32
    %1 = arith.extui %0 : i1 to i32
    %c0_i32_0 = arith.constant 0 : i32
    %c0_i32_1 = arith.constant 0 : i32
    %2 = arith.cmpi ne, %1, %c0_i32_1 : i32
    scf.if %2 {
      %c0_i32_32 = arith.constant 0 : i32
      %c8_i32_33 = arith.constant 8 : i32
      %83 = arith.muli %c0_i32_32, %c8_i32_33 : i32
      %84 = tpu.assume_multiple %83, 8 : i32
      %c0_i32_34 = arith.constant 0 : i32
      %c0_i32_35 = arith.constant 0 : i32
      %85 = tpu.memref_slice %arg3[%c0_i32_0, %c0_i32_34, %c0_i32_35] : memref<1x8x32xbf16, #tpu.memory_space<vmem>> -> memref<1x8x32xbf16, #tpu.memory_space<vmem>>
      %86 = tpu.memref_squeeze %85 : memref<1x8x32xbf16, #tpu.memory_space<vmem>> -> memref<8x32xbf16, #tpu.memory_space<vmem>>
      %87 = arith.index_cast %84 : i32 to index
      %c0_36 = arith.constant 0 : index
      %88 = vector.load %86[%87, %c0_36] : memref<8x32xbf16, #tpu.memory_space<vmem>>, vector<8x32xbf16>
      %c0_37 = arith.constant 0 : index
      %c0_38 = arith.constant 0 : index
      %89 = vector.load %arg6[%c0_37, %c0_38] : memref<32x32xbf16, #tpu.memory_space<vmem>>, vector<32x32xbf16>
      %cst_39 = arith.constant dense<0.000000e+00> : vector<8x32xf32>
      %90 = tpu.matmul %88, %89, %cst_39 {dimension_numbers = #tpu.dot_dimension_numbers<[1], [0], [0], [1], [0, 0, 1, 1], [], []>} : vector<8x32xbf16>, vector<32x32xbf16>, vector<8x32xf32> -> vector<8x32xf32>
      %c0_40 = arith.constant 0 : index
      %c0_41 = arith.constant 0 : index
      %91 = vector.load %arg7[%c0_40, %c0_41] : memref<1x32xf32, #tpu.memory_space<vmem>>, vector<1x32xf32>
      %92 = vector.shape_cast %91 : vector<1x32xf32> to vector<32xf32>
      %93 = vector.shape_cast %92 : vector<32xf32> to vector<1x32xf32>
      %94 = vector.broadcast %93 : vector<1x32xf32> to vector<8x32xf32>
      %95 = arith.addf %90, %94 : vector<8x32xf32>
      %96 = arith.truncf %95 : vector<8x32xf32> to vector<8x32xbf16>
      %c0_42 = arith.constant 0 : index
      %c0_43 = arith.constant 0 : index
      %97 = vector.load %arg8[%c0_42, %c0_43] : memref<32x32xbf16, #tpu.memory_space<vmem>>, vector<32x32xbf16>
      %cst_44 = arith.constant dense<0.000000e+00> : vector<8x32xf32>
      %98 = tpu.matmul %88, %97, %cst_44 {dimension_numbers = #tpu.dot_dimension_numbers<[1], [0], [0], [1], [0, 0, 1, 1], [], []>} : vector<8x32xbf16>, vector<32x32xbf16>, vector<8x32xf32> -> vector<8x32xf32>
      %c0_45 = arith.constant 0 : index
      %c0_46 = arith.constant 0 : index
      %99 = vector.load %arg9[%c0_45, %c0_46] : memref<1x32xf32, #tpu.memory_space<vmem>>, vector<1x32xf32>
      %100 = vector.shape_cast %99 : vector<1x32xf32> to vector<32xf32>
      %101 = vector.shape_cast %100 : vector<32xf32> to vector<1x32xf32>
      %102 = vector.broadcast %101 : vector<1x32xf32> to vector<8x32xf32>
      %103 = arith.addf %98, %102 : vector<8x32xf32>
      %104 = arith.truncf %103 : vector<8x32xf32> to vector<8x32xbf16>
      %105 = vector.extract_strided_slice %96 {offsets = [0, 0], sizes = [8, 8], strides = [1, 1]} : vector<8x32xbf16> to vector<8x8xbf16>
      %c0_47 = arith.constant 0 : index
      %106 = arith.index_cast %84 : i32 to index
      %c0_48 = arith.constant 0 : index
      %107 = vector.load %arg13[%c0_47, %106, %c0_48] : memref<4x8x8xbf16, #tpu.memory_space<vmem>>, vector<1x8x8xbf16>
      %108 = vector.shape_cast %107 : vector<1x8x8xbf16> to vector<8x8xbf16>
      %109 = vector.shape_cast %105 : vector<8x8xbf16> to vector<1x8x8xbf16>
      tpu.vector_store %arg13[%c0_47, %106, %c0_48], %109 {strides = array<i32>} : memref<4x8x8xbf16, #tpu.memory_space<vmem>>, vector<1x8x8xbf16>,
      %110 = vector.extract_strided_slice %104 {offsets = [0, 0], sizes = [8, 8], strides = [1, 1]} : vector<8x32xbf16> to vector<8x8xbf16>
      %c0_49 = arith.constant 0 : index
      %111 = arith.index_cast %84 : i32 to index
      %c0_50 = arith.constant 0 : index
      %112 = vector.load %arg14[%c0_49, %111, %c0_50] : memref<4x8x8xbf16, #tpu.memory_space<vmem>>, vector<1x8x8xbf16>
      %113 = vector.shape_cast %112 : vector<1x8x8xbf16> to vector<8x8xbf16>
      %114 = vector.shape_cast %110 : vector<8x8xbf16> to vector<1x8x8xbf16>
      tpu.vector_store %arg14[%c0_49, %111, %c0_50], %114 {strides = array<i32>} : memref<4x8x8xbf16, #tpu.memory_space<vmem>>, vector<1x8x8xbf16>,
      %115 = vector.extract_strided_slice %96 {offsets = [0, 8], sizes = [8, 8], strides = [1, 1]} : vector<8x32xbf16> to vector<8x8xbf16>
      %c1 = arith.constant 1 : index
      %116 = arith.index_cast %84 : i32 to index
      %c0_51 = arith.constant 0 : index
      %117 = vector.load %arg13[%c1, %116, %c0_51] : memref<4x8x8xbf16, #tpu.memory_space<vmem>>, vector<1x8x8xbf16>
      %118 = vector.shape_cast %117 : vector<1x8x8xbf16> to vector<8x8xbf16>
      %119 = vector.shape_cast %115 : vector<8x8xbf16> to vector<1x8x8xbf16>
      tpu.vector_store %arg13[%c1, %116, %c0_51], %119 {strides = array<i32>} : memref<4x8x8xbf16, #tpu.memory_space<vmem>>, vector<1x8x8xbf16>,
      %120 = vector.extract_strided_slice %104 {offsets = [0, 8], sizes = [8, 8], strides = [1, 1]} : vector<8x32xbf16> to vector<8x8xbf16>
      %c1_52 = arith.constant 1 : index
      %121 = arith.index_cast %84 : i32 to index
      %c0_53 = arith.constant 0 : index
      %122 = vector.load %arg14[%c1_52, %121, %c0_53] : memref<4x8x8xbf16, #tpu.memory_space<vmem>>, vector<1x8x8xbf16>
      %123 = vector.shape_cast %122 : vector<1x8x8xbf16> to vector<8x8xbf16>
      %124 = vector.shape_cast %120 : vector<8x8xbf16> to vector<1x8x8xbf16>
      tpu.vector_store %arg14[%c1_52, %121, %c0_53], %124 {strides = array<i32>} : memref<4x8x8xbf16, #tpu.memory_space<vmem>>, vector<1x8x8xbf16>,
      %125 = vector.extract_strided_slice %96 {offsets = [0, 16], sizes = [8, 8], strides = [1, 1]} : vector<8x32xbf16> to vector<8x8xbf16>
      %c2 = arith.constant 2 : index
      %126 = arith.index_cast %84 : i32 to index
      %c0_54 = arith.constant 0 : index
      %127 = vector.load %arg13[%c2, %126, %c0_54] : memref<4x8x8xbf16, #tpu.memory_space<vmem>>, vector<1x8x8xbf16>
      %128 = vector.shape_cast %127 : vector<1x8x8xbf16> to vector<8x8xbf16>
      %129 = vector.shape_cast %125 : vector<8x8xbf16> to vector<1x8x8xbf16>
      tpu.vector_store %arg13[%c2, %126, %c0_54], %129 {strides = array<i32>} : memref<4x8x8xbf16, #tpu.memory_space<vmem>>, vector<1x8x8xbf16>,
      %130 = vector.extract_strided_slice %104 {offsets = [0, 16], sizes = [8, 8], strides = [1, 1]} : vector<8x32xbf16> to vector<8x8xbf16>
      %c2_55 = arith.constant 2 : index
      %131 = arith.index_cast %84 : i32 to index
      %c0_56 = arith.constant 0 : index
      %132 = vector.load %arg14[%c2_55, %131, %c0_56] : memref<4x8x8xbf16, #tpu.memory_space<vmem>>, vector<1x8x8xbf16>
      %133 = vector.shape_cast %132 : vector<1x8x8xbf16> to vector<8x8xbf16>
      %134 = vector.shape_cast %130 : vector<8x8xbf16> to vector<1x8x8xbf16>
      tpu.vector_store %arg14[%c2_55, %131, %c0_56], %134 {strides = array<i32>} : memref<4x8x8xbf16, #tpu.memory_space<vmem>>, vector<1x8x8xbf16>,
      %135 = vector.extract_strided_slice %96 {offsets = [0, 24], sizes = [8, 8], strides = [1, 1]} : vector<8x32xbf16> to vector<8x8xbf16>
      %c3 = arith.constant 3 : index
      %136 = arith.index_cast %84 : i32 to index
      %c0_57 = arith.constant 0 : index
      %137 = vector.load %arg13[%c3, %136, %c0_57] : memref<4x8x8xbf16, #tpu.memory_space<vmem>>, vector<1x8x8xbf16>
      %138 = vector.shape_cast %137 : vector<1x8x8xbf16> to vector<8x8xbf16>
      %139 = vector.shape_cast %135 : vector<8x8xbf16> to vector<1x8x8xbf16>
      tpu.vector_store %arg13[%c3, %136, %c0_57], %139 {strides = array<i32>} : memref<4x8x8xbf16, #tpu.memory_space<vmem>>, vector<1x8x8xbf16>,
      %140 = vector.extract_strided_slice %104 {offsets = [0, 24], sizes = [8, 8], strides = [1, 1]} : vector<8x32xbf16> to vector<8x8xbf16>
      %c3_58 = arith.constant 3 : index
      %141 = arith.index_cast %84 : i32 to index
      %c0_59 = arith.constant 0 : index
      %142 = vector.load %arg14[%c3_58, %141, %c0_59] : memref<4x8x8xbf16, #tpu.memory_space<vmem>>, vector<1x8x8xbf16>
      %143 = vector.shape_cast %142 : vector<1x8x8xbf16> to vector<8x8xbf16>
      %144 = vector.shape_cast %140 : vector<8x8xbf16> to vector<1x8x8xbf16>
      tpu.vector_store %arg14[%c3_58, %141, %c0_59], %144 {strides = array<i32>} : memref<4x8x8xbf16, #tpu.memory_space<vmem>>, vector<1x8x8xbf16>,
      %c1_i32_60 = arith.constant 1 : i32
    } else {
    }
    %c1_i32 = arith.constant 1 : i32
    %3 = arith.muli %arg1, %c1_i32 : i32
    %4 = arith.addi %3, %arg2 : i32
    %c8_i32 = arith.constant 8 : i32
    %5 = arith.muli %4, %c8_i32 : i32
    %6 = tpu.assume_multiple %5, 8 : i32
    %c0_i32_2 = arith.constant 0 : i32
    %c0_i32_3 = arith.constant 0 : i32
    %c0_i32_4 = arith.constant 0 : i32
    %7 = tpu.memref_slice %arg3[%c0_i32_2, %c0_i32_3, %c0_i32_4] : memref<1x8x32xbf16, #tpu.memory_space<vmem>> -> memref<1x8x32xbf16, #tpu.memory_space<vmem>>
    %8 = tpu.memref_squeeze %7 : memref<1x8x32xbf16, #tpu.memory_space<vmem>> -> memref<8x32xbf16, #tpu.memory_space<vmem>>
    %9 = arith.index_cast %6 : i32 to index
    %c0 = arith.constant 0 : index
    %10 = vector.load %8[%9, %c0] : memref<8x32xbf16, #tpu.memory_space<vmem>>, vector<8x32xbf16>
    %c0_5 = arith.constant 0 : index
    %c0_6 = arith.constant 0 : index
    %11 = vector.load %arg4[%c0_5, %c0_6] : memref<32x32xbf16, #tpu.memory_space<vmem>>, vector<32x32xbf16>
    %cst = arith.constant dense<0.000000e+00> : vector<8x32xf32>
    %12 = tpu.matmul %10, %11, %cst {dimension_numbers = #tpu.dot_dimension_numbers<[1], [0], [0], [1], [0, 0, 1, 1], [], []>} : vector<8x32xbf16>, vector<32x32xbf16>, vector<8x32xf32> -> vector<8x32xf32>
    %c0_7 = arith.constant 0 : index
    %c0_8 = arith.constant 0 : index
    %13 = vector.load %arg5[%c0_7, %c0_8] : memref<1x32xf32, #tpu.memory_space<vmem>>, vector<1x32xf32>
    %14 = vector.shape_cast %13 : vector<1x32xf32> to vector<32xf32>
    %15 = vector.shape_cast %14 : vector<32xf32> to vector<1x32xf32>
    %16 = vector.broadcast %15 : vector<1x32xf32> to vector<8x32xf32>
    %17 = arith.addf %12, %16 : vector<8x32xf32>
    %18 = vector.extract_strided_slice %17 {offsets = [0, 0], sizes = [8, 8], strides = [1, 1]} : vector<8x32xf32> to vector<8x8xf32>
    %19 = vector.extract_strided_slice %17 {offsets = [0, 8], sizes = [8, 8], strides = [1, 1]} : vector<8x32xf32> to vector<8x8xf32>
    %20 = vector.extract_strided_slice %17 {offsets = [0, 16], sizes = [8, 8], strides = [1, 1]} : vector<8x32xf32> to vector<8x8xf32>
    %21 = vector.extract_strided_slice %17 {offsets = [0, 24], sizes = [8, 8], strides = [1, 1]} : vector<8x32xf32> to vector<8x8xf32>
    %22 = vector.shape_cast %18 : vector<8x8xf32> to vector<1x8x8xf32>
    %23 = vector.shape_cast %19 : vector<8x8xf32> to vector<1x8x8xf32>
    %24 = vector.shape_cast %20 : vector<8x8xf32> to vector<1x8x8xf32>
    %25 = vector.shape_cast %21 : vector<8x8xf32> to vector<1x8x8xf32>
    %26 = tpu.concatenate %22, %23, %24, %25 in 0 : vector<1x8x8xf32>, vector<1x8x8xf32>, vector<1x8x8xf32>, vector<1x8x8xf32> -> vector<4x8x8xf32>
    %27 = arith.truncf %26 : vector<4x8x8xf32> to vector<4x8x8xbf16>
    %cst_9 = arith.constant -1.000000e+30 : f32
    %28 = vector.broadcast %cst_9 : f32 to vector<4x8x1xf32>
    %cst_10 = arith.constant 0.000000e+00 : f32
    %29 = vector.broadcast %cst_10 : f32 to vector<4x8x1xf32>
    %cst_11 = arith.constant 0.000000e+00 : f32
    %30 = vector.broadcast %cst_11 : f32 to vector<4x8x8xf32>
    %c0_i32_12 = arith.constant 0 : i32
    %c8_i32_13 = arith.constant 8 : i32
    %31 = arith.muli %c0_i32_12, %c8_i32_13 : i32
    %32 = tpu.assume_multiple %31, 8 : i32
    %c0_14 = arith.constant 0 : index
    %33 = arith.index_cast %32 : i32 to index
    %c0_15 = arith.constant 0 : index
    %34 = vector.load %arg13[%c0_14, %33, %c0_15] : memref<4x8x8xbf16, #tpu.memory_space<vmem>>, vector<4x8x8xbf16>
    %c0_16 = arith.constant 0 : index
    %35 = arith.index_cast %32 : i32 to index
    %c0_17 = arith.constant 0 : index
    %36 = vector.load %arg14[%c0_16, %35, %c0_17] : memref<4x8x8xbf16, #tpu.memory_space<vmem>>, vector<4x8x8xbf16>
    "tpu.trace_start"() <{level = 10 : i32, message = "hqd,hkd->hqk"}> : () -> ()
    %cst_18 = arith.constant dense<0.000000e+00> : vector<4x8x8xf32>
    %37 = tpu.matmul %27, %34, %cst_18 {dimension_numbers = #tpu.dot_dimension_numbers<[2], [2], [1], [1], [0, 0, 0, 1, 1, 1], [0], [0]>} : vector<4x8x8xbf16>, vector<4x8x8xbf16>, vector<4x8x8xf32> -> vector<4x8x8xf32>
    "tpu.trace_stop"() : () -> ()
    %cst_19 = arith.constant dense<0xFF800000> : vector<4x8xf32>
    %38 = vector.multi_reduction <maximumf>, %37, %cst_19 [2] : vector<4x8x8xf32> to vector<4x8xf32>
    %39 = vector.shape_cast %38 : vector<4x8xf32> to vector<4x8x1xf32>
    %40 = arith.maximumf %28, %39 : vector<4x8x1xf32>
    %41 = arith.subf %28, %40 : vector<4x8x1xf32>
    %42 = math.exp %41 : vector<4x8x1xf32>
    %43 = vector.broadcast %40 : vector<4x8x1xf32> to vector<4x8x8xf32>
    %44 = arith.subf %37, %43 : vector<4x8x8xf32>
    %45 = math.exp %44 : vector<4x8x8xf32>
    %46 = arith.mulf %42, %29 : vector<4x8x1xf32>
    %cst_20 = arith.constant dense<0.000000e+00> : vector<4x8xf32>
    %47 = vector.multi_reduction <add>, %45, %cst_20 [2] : vector<4x8x8xf32> to vector<4x8xf32>
    %48 = vector.shape_cast %47 : vector<4x8xf32> to vector<4x8x1xf32>
    %49 = arith.addf %46, %48 : vector<4x8x1xf32>
    %50 = vector.broadcast %42 : vector<4x8x1xf32> to vector<4x8x8xf32>
    %51 = arith.mulf %50, %30 : vector<4x8x8xf32>
    %52 = arith.truncf %45 : vector<4x8x8xf32> to vector<4x8x8xbf16>
    "tpu.trace_start"() <{level = 10 : i32, message = "hqk,hkd->hqd"}> : () -> ()
    %cst_21 = arith.constant dense<0.000000e+00> : vector<4x8x8xf32>
    %53 = tpu.matmul %52, %36, %cst_21 {dimension_numbers = #tpu.dot_dimension_numbers<[2], [1], [1], [2], [0, 0, 0, 1, 1, 2], [0], [0]>} : vector<4x8x8xbf16>, vector<4x8x8xbf16>, vector<4x8x8xf32> -> vector<4x8x8xf32>
    "tpu.trace_stop"() : () -> ()
    %54 = arith.addf %51, %53 : vector<4x8x8xf32>
    %c1_i32_22 = arith.constant 1 : i32
    %55 = tpu.reciprocal %49 {approx = true} : vector<4x8x1xf32> -> vector<4x8x1xf32>
    %56 = vector.broadcast %55 : vector<4x8x1xf32> to vector<4x8x8xf32>
    %57 = arith.mulf %54, %56 : vector<4x8x8xf32>
    %58 = arith.extf %10 : vector<8x32xbf16> to vector<8x32xf32>
    %59 = vector.extract_strided_slice %57 {offsets = [0, 0, 0], sizes = [1, 8, 8], strides = [1, 1, 1]} : vector<4x8x8xf32> to vector<1x8x8xf32>
    %60 = vector.shape_cast %59 : vector<1x8x8xf32> to vector<8x8xf32>
    %61 = vector.extract_strided_slice %57 {offsets = [1, 0, 0], sizes = [1, 8, 8], strides = [1, 1, 1]} : vector<4x8x8xf32> to vector<1x8x8xf32>
    %62 = vector.shape_cast %61 : vector<1x8x8xf32> to vector<8x8xf32>
    %63 = vector.extract_strided_slice %57 {offsets = [2, 0, 0], sizes = [1, 8, 8], strides = [1, 1, 1]} : vector<4x8x8xf32> to vector<1x8x8xf32>
    %64 = vector.shape_cast %63 : vector<1x8x8xf32> to vector<8x8xf32>
    %65 = vector.extract_strided_slice %57 {offsets = [3, 0, 0], sizes = [1, 8, 8], strides = [1, 1, 1]} : vector<4x8x8xf32> to vector<1x8x8xf32>
    %66 = vector.shape_cast %65 : vector<1x8x8xf32> to vector<8x8xf32>
    %67 = tpu.concatenate %60, %62, %64, %66 in 1 : vector<8x8xf32>, vector<8x8xf32>, vector<8x8xf32>, vector<8x8xf32> -> vector<8x32xf32>
    %68 = arith.addf %58, %67 : vector<8x32xf32>
    %69 = arith.truncf %68 : vector<8x32xf32> to vector<8x32xbf16>
    %c0_23 = arith.constant 0 : index
    %c0_24 = arith.constant 0 : index
    %70 = vector.load %arg10[%c0_23, %c0_24] : memref<32x32xbf16, #tpu.memory_space<vmem>>, vector<32x32xbf16>
    %cst_25 = arith.constant dense<0.000000e+00> : vector<8x32xf32>
    %71 = tpu.matmul %69, %70, %cst_25 {dimension_numbers = #tpu.dot_dimension_numbers<[1], [0], [0], [1], [0, 0, 1, 1], [], []>} : vector<8x32xbf16>, vector<32x32xbf16>, vector<8x32xf32> -> vector<8x32xf32>
    %c0_26 = arith.constant 0 : index
    %c0_27 = arith.constant 0 : index
    %72 = vector.load %arg11[%c0_26, %c0_27] : memref<1x32xf32, #tpu.memory_space<vmem>>, vector<1x32xf32>
    %73 = vector.shape_cast %72 : vector<1x32xf32> to vector<32xf32>
    %74 = vector.shape_cast %73 : vector<32xf32> to vector<1x32xf32>
    %75 = vector.broadcast %74 : vector<1x32xf32> to vector<8x32xf32>
    %76 = arith.addf %71, %75 : vector<8x32xf32>
    %cst_28 = arith.constant 0.000000e+00 : f32
    %77 = vector.broadcast %cst_28 : f32 to vector<8x32xf32>
    %78 = arith.maximumf %76, %77 : vector<8x32xf32>
    %79 = arith.addf %68, %78 : vector<8x32xf32>
    %c0_29 = arith.constant 0 : index
    %c0_30 = arith.constant 0 : index
    %c0_31 = arith.constant 0 : index
    %80 = vector.load %arg12[%c0_29, %c0_30, %c0_31] : memref<1x8x32xf32, #tpu.memory_space<vmem>>, vector<1x8x32xf32>
    %81 = vector.shape_cast %80 : vector<1x8x32xf32> to vector<8x32xf32>
    %82 = vector.shape_cast %79 : vector<8x32xf32> to vector<1x8x32xf32>
    tpu.vector_store %arg12[%c0_29, %c0_30, %c0_31], %82 {strides = array<i32>} : memref<1x8x32xf32, #tpu.memory_space<vmem>>, vector<1x8x32xf32>,
    return
  }
  func.func @transform_0(%arg0: i32, %arg1: i32, %arg2: i32) -> (i32, i32, i32) {
    %c0_i32 = arith.constant 0 : i32
    %c0_i32_0 = arith.constant 0 : i32
    %c0_i32_1 = arith.constant 0 : i32
    return %arg0, %c0_i32, %c0_i32_0 : i32, i32, i32
  }
  func.func @transform_1(%arg0: i32, %arg1: i32, %arg2: i32) -> (i32, i32) {
    %c0_i32 = arith.constant 0 : i32
    %c0_i32_0 = arith.constant 0 : i32
    %c0_i32_1 = arith.constant 0 : i32
    return %c0_i32, %c0_i32_0 : i32, i32
  }
  func.func @transform_2(%arg0: i32, %arg1: i32, %arg2: i32) -> (i32, i32) {
    %c0_i32 = arith.constant 0 : i32
    %c0_i32_0 = arith.constant 0 : i32
    %c0_i32_1 = arith.constant 0 : i32
    return %c0_i32, %c0_i32_0 : i32, i32
  }
  func.func @transform_3(%arg0: i32, %arg1: i32, %arg2: i32) -> (i32, i32) {
    %c0_i32 = arith.constant 0 : i32
    %c0_i32_0 = arith.constant 0 : i32
    %c0_i32_1 = arith.constant 0 : i32
    return %c0_i32, %c0_i32_0 : i32, i32
  }
  func.func @transform_4(%arg0: i32, %arg1: i32, %arg2: i32) -> (i32, i32) {
    %c0_i32 = arith.constant 0 : i32
    %c0_i32_0 = arith.constant 0 : i32
    %c0_i32_1 = arith.constant 0 : i32
    return %c0_i32, %c0_i32_0 : i32, i32
  }
  func.func @transform_5(%arg0: i32, %arg1: i32, %arg2: i32) -> (i32, i32) {
    %c0_i32 = arith.constant 0 : i32
    %c0_i32_0 = arith.constant 0 : i32
    %c0_i32_1 = arith.constant 0 : i32
    return %c0_i32, %c0_i32_0 : i32, i32
  }
  func.func @transform_6(%arg0: i32, %arg1: i32, %arg2: i32) -> (i32, i32) {
    %c0_i32 = arith.constant 0 : i32
    %c0_i32_0 = arith.constant 0 : i32
    %c0_i32_1 = arith.constant 0 : i32
    return %c0_i32, %c0_i32_0 : i32, i32
  }
  func.func @transform_7(%arg0: i32, %arg1: i32, %arg2: i32) -> (i32, i32) {
    %c0_i32 = arith.constant 0 : i32
    %c0_i32_0 = arith.constant 0 : i32
    %c0_i32_1 = arith.constant 0 : i32
    return %c0_i32, %c0_i32_0 : i32, i32
  }
  func.func @transform_8(%arg0: i32, %arg1: i32, %arg2: i32) -> (i32, i32) {
    %c0_i32 = arith.constant 0 : i32
    %c0_i32_0 = arith.constant 0 : i32
    %c0_i32_1 = arith.constant 0 : i32
    return %c0_i32, %c0_i32_0 : i32, i32
  }
  func.func @transform_9(%arg0: i32, %arg1: i32, %arg2: i32) -> (i32, i32, i32) {
    %c1_i32 = arith.constant 1 : i32
    %0 = arith.muli %arg1, %c1_i32 : i32
    %1 = arith.addi %0, %arg2 : i32
    %c0_i32 = arith.constant 0 : i32
    %c0_i32_0 = arith.constant 0 : i32
    return %arg0, %1, %c0_i32 : i32, i32, i32
  }
}

module attributes {stable_mosaic.version = 11 : i64} {
  func.func @_sab_kernel(%arg0: i32, %arg1: i32, %arg2: i32, %arg3: memref<1x8x32xbf16, #tpu.memory_space<vmem>>, %arg4: memref<32x32xbf16, #tpu.memory_space<vmem>>, %arg5: memref<1x32xf32, #tpu.memory_space<vmem>>, %arg6: memref<32x32xbf16, #tpu.memory_space<vmem>>, %arg7: memref<1x32xf32, #tpu.memory_space<vmem>>, %arg8: memref<32x32xbf16, #tpu.memory_space<vmem>>, %arg9: memref<1x32xf32, #tpu.memory_space<vmem>>, %arg10: memref<32x32xbf16, #tpu.memory_space<vmem>>, %arg11: memref<1x32xf32, #tpu.memory_space<vmem>>, %arg12: memref<1x8x32xf32, #tpu.memory_space<vmem>>, %arg13: memref<4x8x8xbf16, #tpu.memory_space<vmem>>, %arg14: memref<4x8x8xbf16, #tpu.memory_space<vmem>>) attributes {dimension_semantics = [#tpu.dimension_semantics<parallel>, #tpu.dimension_semantics<parallel>, #tpu.dimension_semantics<arbitrary>], iteration_bounds = array<i64: 2, 1, 1>, scalar_prefetch = 0 : i64, scratch_operands = 2 : i64, tpu.core_type = #tpu.core_type<tc>, window_params = [{transform_indices = @transform_0, window_bounds = array<i64: 1, 8, 32>}, {pipeline_mode = #tpu.pipeline_mode<synchronous>, transform_indices = @transform_1, window_bounds = array<i64: 32, 32>}, {pipeline_mode = #tpu.pipeline_mode<synchronous>, transform_indices = @transform_2, window_bounds = array<i64: 1, 32>}, {pipeline_mode = #tpu.pipeline_mode<synchronous>, transform_indices = @transform_3, window_bounds = array<i64: 32, 32>}, {pipeline_mode = #tpu.pipeline_mode<synchronous>, transform_indices = @transform_4, window_bounds = array<i64: 1, 32>}, {pipeline_mode = #tpu.pipeline_mode<synchronous>, transform_indices = @transform_5, window_bounds = array<i64: 32, 32>}, {pipeline_mode = #tpu.pipeline_mode<synchronous>, transform_indices = @transform_6, window_bounds = array<i64: 1, 32>}, {pipeline_mode = #tpu.pipeline_mode<synchronous>, transform_indices = @transform_7, window_bounds = array<i64: 32, 32>}, {pipeline_mode = #tpu.pipeline_mode<synchronous>, transform_indices = @transform_8, window_bounds = array<i64: 1, 32>}, {transform_indices = @transform_9, window_bounds = array<i64: 1, 8, 32>}]} {
    %c0_i32 = arith.constant 0 : i32
    %0 = arith.cmpi eq, %arg2, %c0_i32 : i32
    %1 = arith.extui %0 : i1 to i32
    %c0_i32_0 = arith.constant 0 : i32
    %c0_i32_1 = arith.constant 0 : i32
    %2 = arith.cmpi ne, %1, %c0_i32_1 : i32
    scf.if %2 {
      %c0_i32_32 = arith.constant 0 : i32
      %c8_i32_33 = arith.constant 8 : i32
      %83 = arith.muli %c0_i32_32, %c8_i32_33 : i32
      %84 = tpu.assume_multiple %83, 8 : i32
      %c0_i32_34 = arith.constant 0 : i32
      %c0_i32_35 = arith.constant 0 : i32
      %85 = tpu.memref_slice %arg3[%c0_i32_0, %c0_i32_34, %c0_i32_35] : memref<1x8x32xbf16, #tpu.memory_space<vmem>> -> memref<1x8x32xbf16, #tpu.memory_space<vmem>>
      %86 = tpu.memref_squeeze %85 : memref<1x8x32xbf16, #tpu.memory_space<vmem>> -> memref<8x32xbf16, #tpu.memory_space<vmem>>
      %87 = arith.index_cast %84 : i32 to index
      %c0_36 = arith.constant 0 : index
      %88 = vector.load %86[%87, %c0_36] : memref<8x32xbf16, #tpu.memory_space<vmem>>, vector<8x32xbf16>
      %c0_37 = arith.constant 0 : index
      %c0_38 = arith.constant 0 : index
      %89 = vector.load %arg6[%c0_37, %c0_38] : memref<32x32xbf16, #tpu.memory_space<vmem>>, vector<32x32xbf16>
      %cst_39 = arith.constant dense<0.000000e+00> : vector<8x32xf32>
      %90 = tpu.matmul %88, %89, %cst_39 {dimension_numbers = #tpu.dot_dimension_numbers<[1], [0], [0], [1], [0, 0, 1, 1], [], []>} : vector<8x32xbf16>, vector<32x32xbf16>, vector<8x32xf32> -> vector<8x32xf32>
      %c0_40 = arith.constant 0 : index
      %c0_41 = arith.constant 0 : index
      %91 = vector.load %arg7[%c0_40, %c0_41] : memref<1x32xf32, #tpu.memory_space<vmem>>, vector<1x32xf32>
      %92 = vector.shape_cast %91 : vector<1x32xf32> to vector<32xf32>
      %93 = vector.shape_cast %92 : vector<32xf32> to vector<1x32xf32>
      %94 = vector.broadcast %93 : vector<1x32xf32> to vector<8x32xf32>
      %95 = arith.addf %90, %94 : vector<8x32xf32>
      %96 = arith.truncf %95 : vector<8x32xf32> to vector<8x32xbf16>
      %c0_42 = arith.constant 0 : index
      %c0_43 = arith.constant 0 : index
      %97 = vector.load %arg8[%c0_42, %c0_43] : memref<32x32xbf16, #tpu.memory_space<vmem>>, vector<32x32xbf16>
      %cst_44 = arith.constant dense<0.000000e+00> : vector<8x32xf32>
      %98 = tpu.matmul %88, %97, %cst_44 {dimension_numbers = #tpu.dot_dimension_numbers<[1], [0], [0], [1], [0, 0, 1, 1], [], []>} : vector<8x32xbf16>, vector<32x32xbf16>, vector<8x32xf32> -> vector<8x32xf32>
      %c0_45 = arith.constant 0 : index
      %c0_46 = arith.constant 0 : index
      %99 = vector.load %arg9[%c0_45, %c0_46] : memref<1x32xf32, #tpu.memory_space<vmem>>, vector<1x32xf32>
      %100 = vector.shape_cast %99 : vector<1x32xf32> to vector<32xf32>
      %101 = vector.shape_cast %100 : vector<32xf32> to vector<1x32xf32>
      %102 = vector.broadcast %101 : vector<1x32xf32> to vector<8x32xf32>
      %103 = arith.addf %98, %102 : vector<8x32xf32>
      %104 = arith.truncf %103 : vector<8x32xf32> to vector<8x32xbf16>
      %105 = vector.extract_strided_slice %96 {offsets = [0, 0], sizes = [8, 8], strides = [1, 1]} : vector<8x32xbf16> to vector<8x8xbf16>
      %c0_47 = arith.constant 0 : index
      %106 = arith.index_cast %84 : i32 to index
      %c0_48 = arith.constant 0 : index
      %107 = vector.load %arg13[%c0_47, %106, %c0_48] : memref<4x8x8xbf16, #tpu.memory_space<vmem>>, vector<1x8x8xbf16>
      %108 = vector.shape_cast %107 : vector<1x8x8xbf16> to vector<8x8xbf16>
      %109 = vector.shape_cast %105 : vector<8x8xbf16> to vector<1x8x8xbf16>
      tpu.vector_store %arg13[%c0_47, %106, %c0_48], %109 {strides = array<i32>} : memref<4x8x8xbf16, #tpu.memory_space<vmem>>, vector<1x8x8xbf16>,
      %110 = vector.extract_strided_slice %104 {offsets = [0, 0], sizes = [8, 8], strides = [1, 1]} : vector<8x32xbf16> to vector<8x8xbf16>
      %c0_49 = arith.constant 0 : index
      %111 = arith.index_cast %84 : i32 to index
      %c0_50 = arith.constant 0 : index
      %112 = vector.load %arg14[%c0_49, %111, %c0_50] : memref<4x8x8xbf16, #tpu.memory_space<vmem>>, vector<1x8x8xbf16>
      %113 = vector.shape_cast %112 : vector<1x8x8xbf16> to vector<8x8xbf16>
      %114 = vector.shape_cast %110 : vector<8x8xbf16> to vector<1x8x8xbf16>
      tpu.vector_store %arg14[%c0_49, %111, %c0_50], %114 {strides = array<i32>} : memref<4x8x8xbf16, #tpu.memory_space<vmem>>, vector<1x8x8xbf16>,
      %115 = vector.extract_strided_slice %96 {offsets = [0, 8], sizes = [8, 8], strides = [1, 1]} : vector<8x32xbf16> to vector<8x8xbf16>
      %c1 = arith.constant 1 : index
      %116 = arith.index_cast %84 : i32 to index
      %c0_51 = arith.constant 0 : index
      %117 = vector.load %arg13[%c1, %116, %c0_51] : memref<4x8x8xbf16, #tpu.memory_space<vmem>>, vector<1x8x8xbf16>
      %118 = vector.shape_cast %117 : vector<1x8x8xbf16> to vector<8x8xbf16>
      %119 = vector.shape_cast %115 : vector<8x8xbf16> to vector<1x8x8xbf16>
      tpu.vector_store %arg13[%c1, %116, %c0_51], %119 {strides = array<i32>} : memref<4x8x8xbf16, #tpu.memory_space<vmem>>, vector<1x8x8xbf16>,
      %120 = vector.extract_strided_slice %104 {offsets = [0, 8], sizes = [8, 8], strides = [1, 1]} : vector<8x32xbf16> to vector<8x8xbf16>
      %c1_52 = arith.constant 1 : index
      %121 = arith.index_cast %84 : i32 to index
      %c0_53 = arith.constant 0 : index
      %122 = vector.load %arg14[%c1_52, %121, %c0_53] : memref<4x8x8xbf16, #tpu.memory_space<vmem>>, vector<1x8x8xbf16>
      %123 = vector.shape_cast %122 : vector<1x8x8xbf16> to vector<8x8xbf16>
      %124 = vector.shape_cast %120 : vector<8x8xbf16> to vector<1x8x8xbf16>
      tpu.vector_store %arg14[%c1_52, %121, %c0_53], %124 {strides = array<i32>} : memref<4x8x8xbf16, #tpu.memory_space<vmem>>, vector<1x8x8xbf16>,
      %125 = vector.extract_strided_slice %96 {offsets = [0, 16], sizes = [8, 8], strides = [1, 1]} : vector<8x32xbf16> to vector<8x8xbf16>
      %c2 = arith.constant 2 : index
      %126 = arith.index_cast %84 : i32 to index
      %c0_54 = arith.constant 0 : index
      %127 = vector.load %arg13[%c2, %126, %c0_54] : memref<4x8x8xbf16, #tpu.memory_space<vmem>>, vector<1x8x8xbf16>
      %128 = vector.shape_cast %127 : vector<1x8x8xbf16> to vector<8x8xbf16>
      %129 = vector.shape_cast %125 : vector<8x8xbf16> to vector<1x8x8xbf16>
      tpu.vector_store %arg13[%c2, %126, %c0_54], %129 {strides = array<i32>} : memref<4x8x8xbf16, #tpu.memory_space<vmem>>, vector<1x8x8xbf16>,
      %130 = vector.extract_strided_slice %104 {offsets = [0, 16], sizes = [8, 8], strides = [1, 1]} : vector<8x32xbf16> to vector<8x8xbf16>
      %c2_55 = arith.constant 2 : index
      %131 = arith.index_cast %84 : i32 to index
      %c0_56 = arith.constant 0 : index
      %132 = vector.load %arg14[%c2_55, %131, %c0_56] : memref<4x8x8xbf16, #tpu.memory_space<vmem>>, vector<1x8x8xbf16>
      %133 = vector.shape_cast %132 : vector<1x8x8xbf16> to vector<8x8xbf16>
      %134 = vector.shape_cast %130 : vector<8x8xbf16> to vector<1x8x8xbf16>
      tpu.vector_store %arg14[%c2_55, %131, %c0_56], %134 {strides = array<i32>} : memref<4x8x8xbf16, #tpu.memory_space<vmem>>, vector<1x8x8xbf16>,
      %135 = vector.extract_strided_slice %96 {offsets = [0, 24], sizes = [8, 8], strides = [1, 1]} : vector<8x32xbf16> to vector<8x8xbf16>
      %c3 = arith.constant 3 : index
      %136 = arith.index_cast %84 : i32 to index
      %c0_57 = arith.constant 0 : index
      %137 = vector.load %arg13[%c3, %136, %c0_57] : memref<4x8x8xbf16, #tpu.memory_space<vmem>>, vector<1x8x8xbf16>
      %138 = vector.shape_cast %137 : vector<1x8x8xbf16> to vector<8x8xbf16>
      %139 = vector.shape_cast %135 : vector<8x8xbf16> to vector<1x8x8xbf16>
      tpu.vector_store %arg13[%c3, %136, %c0_57], %139 {strides = array<i32>} : memref<4x8x8xbf16, #tpu.memory_space<vmem>>, vector<1x8x8xbf16>,
      %140 = vector.extract_strided_slice %104 {offsets = [0, 24], sizes = [8, 8], strides = [1, 1]} : vector<8x32xbf16> to vector<8x8xbf16>
      %c3_58 = arith.constant 3 : index
      %141 = arith.index_cast %84 : i32 to index
      %c0_59 = arith.constant 0 : index
      %142 = vector.load %arg14[%c3_58, %141, %c0_59] : memref<4x8x8xbf16, #tpu.memory_space<vmem>>, vector<1x8x8xbf16>
      %143 = vector.shape_cast %142 : vector<1x8x8xbf16> to vector<8x8xbf16>
      %144 = vector.shape_cast %140 : vector<8x8xbf16> to vector<1x8x8xbf16>
      tpu.vector_store %arg14[%c3_58, %141, %c0_59], %144 {strides = array<i32>} : memref<4x8x8xbf16, #tpu.memory_space<vmem>>, vector<1x8x8xbf16>,
      %c1_i32_60 = arith.constant 1 : i32
    } else {
    }
    %c1_i32 = arith.constant 1 : i32
    %3 = arith.muli %arg1, %c1_i32 : i32
    %4 = arith.addi %3, %arg2 : i32
    %c8_i32 = arith.constant 8 : i32
    %5 = arith.muli %4, %c8_i32 : i32
    %6 = tpu.assume_multiple %5, 8 : i32
    %c0_i32_2 = arith.constant 0 : i32
    %c0_i32_3 = arith.constant 0 : i32
    %c0_i32_4 = arith.constant 0 : i32
    %7 = tpu.memref_slice %arg3[%c0_i32_2, %c0_i32_3, %c0_i32_4] : memref<1x8x32xbf16, #tpu.memory_space<vmem>> -> memref<1x8x32xbf16, #tpu.memory_space<vmem>>
    %8 = tpu.memref_squeeze %7 : memref<1x8x32xbf16, #tpu.memory_space<vmem>> -> memref<8x32xbf16, #tpu.memory_space<vmem>>
    %9 = arith.index_cast %6 : i32 to index
    %c0 = arith.constant 0 : index
    %10 = vector.load %8[%9, %c0] : memref<8x32xbf16, #tpu.memory_space<vmem>>, vector<8x32xbf16>
    %c0_5 = arith.constant 0 : index
    %c0_6 = arith.constant 0 : index
    %11 = vector.load %arg4[%c0_5, %c0_6] : memref<32x32xbf16, #tpu.memory_space<vmem>>, vector<32x32xbf16>
    %cst = arith.constant dense<0.000000e+00> : vector<8x32xf32>
    %12 = tpu.matmul %10, %11, %cst {dimension_numbers = #tpu.dot_dimension_numbers<[1], [0], [0], [1], [0, 0, 1, 1], [], []>} : vector<8x32xbf16>, vector<32x32xbf16>, vector<8x32xf32> -> vector<8x32xf32>
    %c0_7 = arith.constant 0 : index
    %c0_8 = arith.constant 0 : index
    %13 = vector.load %arg5[%c0_7, %c0_8] : memref<1x32xf32, #tpu.memory_space<vmem>>, vector<1x32xf32>
    %14 = vector.shape_cast %13 : vector<1x32xf32> to vector<32xf32>
    %15 = vector.shape_cast %14 : vector<32xf32> to vector<1x32xf32>
    %16 = vector.broadcast %15 : vector<1x32xf32> to vector<8x32xf32>
    %17 = arith.addf %12, %16 : vector<8x32xf32>
    %18 = vector.extract_strided_slice %17 {offsets = [0, 0], sizes = [8, 8], strides = [1, 1]} : vector<8x32xf32> to vector<8x8xf32>
    %19 = vector.extract_strided_slice %17 {offsets = [0, 8], sizes = [8, 8], strides = [1, 1]} : vector<8x32xf32> to vector<8x8xf32>
    %20 = vector.extract_strided_slice %17 {offsets = [0, 16], sizes = [8, 8], strides = [1, 1]} : vector<8x32xf32> to vector<8x8xf32>
    %21 = vector.extract_strided_slice %17 {offsets = [0, 24], sizes = [8, 8], strides = [1, 1]} : vector<8x32xf32> to vector<8x8xf32>
    %22 = vector.shape_cast %18 : vector<8x8xf32> to vector<1x8x8xf32>
    %23 = vector.shape_cast %19 : vector<8x8xf32> to vector<1x8x8xf32>
    %24 = vector.shape_cast %20 : vector<8x8xf32> to vector<1x8x8xf32>
    %25 = vector.shape_cast %21 : vector<8x8xf32> to vector<1x8x8xf32>
    %26 = tpu.concatenate %22, %23, %24, %25 in 0 : vector<1x8x8xf32>, vector<1x8x8xf32>, vector<1x8x8xf32>, vector<1x8x8xf32> -> vector<4x8x8xf32>
    %27 = arith.truncf %26 : vector<4x8x8xf32> to vector<4x8x8xbf16>
    %cst_9 = arith.constant -1.000000e+30 : f32
    %28 = vector.broadcast %cst_9 : f32 to vector<4x8x1xf32>
    %cst_10 = arith.constant 0.000000e+00 : f32
    %29 = vector.broadcast %cst_10 : f32 to vector<4x8x1xf32>
    %cst_11 = arith.constant 0.000000e+00 : f32
    %30 = vector.broadcast %cst_11 : f32 to vector<4x8x8xf32>
    %c0_i32_12 = arith.constant 0 : i32
    %c8_i32_13 = arith.constant 8 : i32
    %31 = arith.muli %c0_i32_12, %c8_i32_13 : i32
    %32 = tpu.assume_multiple %31, 8 : i32
    %c0_14 = arith.constant 0 : index
    %33 = arith.index_cast %32 : i32 to index
    %c0_15 = arith.constant 0 : index
    %34 = vector.load %arg13[%c0_14, %33, %c0_15] : memref<4x8x8xbf16, #tpu.memory_space<vmem>>, vector<4x8x8xbf16>
    %c0_16 = arith.constant 0 : index
    %35 = arith.index_cast %32 : i32 to index
    %c0_17 = arith.constant 0 : index
    %36 = vector.load %arg14[%c0_16, %35, %c0_17] : memref<4x8x8xbf16, #tpu.memory_space<vmem>>, vector<4x8x8xbf16>
    "tpu.trace_start"() <{level = 10 : i32, message = "hqd,hkd->hqk"}> : () -> ()
    %cst_18 = arith.constant dense<0.000000e+00> : vector<4x8x8xf32>
    %37 = tpu.matmul %27, %34, %cst_18 {dimension_numbers = #tpu.dot_dimension_numbers<[2], [2], [1], [1], [0, 0, 0, 1, 1, 1], [0], [0]>} : vector<4x8x8xbf16>, vector<4x8x8xbf16>, vector<4x8x8xf32> -> vector<4x8x8xf32>
    "tpu.trace_stop"() : () -> ()
    %cst_19 = arith.constant dense<0xFF800000> : vector<4x8xf32>
    %38 = vector.multi_reduction <maximumf>, %37, %cst_19 [2] : vector<4x8x8xf32> to vector<4x8xf32>
    %39 = vector.shape_cast %38 : vector<4x8xf32> to vector<4x8x1xf32>
    %40 = arith.maximumf %28, %39 : vector<4x8x1xf32>
    %41 = arith.subf %28, %40 : vector<4x8x1xf32>
    %42 = math.exp %41 : vector<4x8x1xf32>
    %43 = vector.broadcast %40 : vector<4x8x1xf32> to vector<4x8x8xf32>
    %44 = arith.subf %37, %43 : vector<4x8x8xf32>
    %45 = math.exp %44 : vector<4x8x8xf32>
    %46 = arith.mulf %42, %29 : vector<4x8x1xf32>
    %cst_20 = arith.constant dense<0.000000e+00> : vector<4x8xf32>
    %47 = vector.multi_reduction <add>, %45, %cst_20 [2] : vector<4x8x8xf32> to vector<4x8xf32>
    %48 = vector.shape_cast %47 : vector<4x8xf32> to vector<4x8x1xf32>
    %49 = arith.addf %46, %48 : vector<4x8x1xf32>
    %50 = vector.broadcast %42 : vector<4x8x1xf32> to vector<4x8x8xf32>
    %51 = arith.mulf %50, %30 : vector<4x8x8xf32>
    %52 = arith.truncf %45 : vector<4x8x8xf32> to vector<4x8x8xbf16>
    "tpu.trace_start"() <{level = 10 : i32, message = "hqk,hkd->hqd"}> : () -> ()
    %cst_21 = arith.constant dense<0.000000e+00> : vector<4x8x8xf32>
    %53 = tpu.matmul %52, %36, %cst_21 {dimension_numbers = #tpu.dot_dimension_numbers<[2], [1], [1], [2], [0, 0, 0, 1, 1, 2], [0], [0]>} : vector<4x8x8xbf16>, vector<4x8x8xbf16>, vector<4x8x8xf32> -> vector<4x8x8xf32>
    "tpu.trace_stop"() : () -> ()
    %54 = arith.addf %51, %53 : vector<4x8x8xf32>
    %c1_i32_22 = arith.constant 1 : i32
    %55 = tpu.reciprocal %49 {approx = true} : vector<4x8x1xf32> -> vector<4x8x1xf32>
    %56 = vector.broadcast %55 : vector<4x8x1xf32> to vector<4x8x8xf32>
    %57 = arith.mulf %54, %56 : vector<4x8x8xf32>
    %58 = arith.extf %10 : vector<8x32xbf16> to vector<8x32xf32>
    %59 = vector.extract_strided_slice %57 {offsets = [0, 0, 0], sizes = [1, 8, 8], strides = [1, 1, 1]} : vector<4x8x8xf32> to vector<1x8x8xf32>
    %60 = vector.shape_cast %59 : vector<1x8x8xf32> to vector<8x8xf32>
    %61 = vector.extract_strided_slice %57 {offsets = [1, 0, 0], sizes = [1, 8, 8], strides = [1, 1, 1]} : vector<4x8x8xf32> to vector<1x8x8xf32>
    %62 = vector.shape_cast %61 : vector<1x8x8xf32> to vector<8x8xf32>
    %63 = vector.extract_strided_slice %57 {offsets = [2, 0, 0], sizes = [1, 8, 8], strides = [1, 1, 1]} : vector<4x8x8xf32> to vector<1x8x8xf32>
    %64 = vector.shape_cast %63 : vector<1x8x8xf32> to vector<8x8xf32>
    %65 = vector.extract_strided_slice %57 {offsets = [3, 0, 0], sizes = [1, 8, 8], strides = [1, 1, 1]} : vector<4x8x8xf32> to vector<1x8x8xf32>
    %66 = vector.shape_cast %65 : vector<1x8x8xf32> to vector<8x8xf32>
    %67 = tpu.concatenate %60, %62, %64, %66 in 1 : vector<8x8xf32>, vector<8x8xf32>, vector<8x8xf32>, vector<8x8xf32> -> vector<8x32xf32>
    %68 = arith.addf %58, %67 : vector<8x32xf32>
    %69 = arith.truncf %68 : vector<8x32xf32> to vector<8x32xbf16>
    %c0_23 = arith.constant 0 : index
    %c0_24 = arith.constant 0 : index
    %70 = vector.load %arg10[%c0_23, %c0_24] : memref<32x32xbf16, #tpu.memory_space<vmem>>, vector<32x32xbf16>
    %cst_25 = arith.constant dense<0.000000e+00> : vector<8x32xf32>
    %71 = tpu.matmul %69, %70, %cst_25 {dimension_numbers = #tpu.dot_dimension_numbers<[1], [0], [0], [1], [0, 0, 1, 1], [], []>} : vector<8x32xbf16>, vector<32x32xbf16>, vector<8x32xf32> -> vector<8x32xf32>
    %c0_26 = arith.constant 0 : index
    %c0_27 = arith.constant 0 : index
    %72 = vector.load %arg11[%c0_26, %c0_27] : memref<1x32xf32, #tpu.memory_space<vmem>>, vector<1x32xf32>
    %73 = vector.shape_cast %72 : vector<1x32xf32> to vector<32xf32>
    %74 = vector.shape_cast %73 : vector<32xf32> to vector<1x32xf32>
    %75 = vector.broadcast %74 : vector<1x32xf32> to vector<8x32xf32>
    %76 = arith.addf %71, %75 : vector<8x32xf32>
    %cst_28 = arith.constant 0.000000e+00 : f32
    %77 = vector.broadcast %cst_28 : f32 to vector<8x32xf32>
    %78 = arith.maximumf %76, %77 : vector<8x32xf32>
    %79 = arith.addf %68, %78 : vector<8x32xf32>
    %c0_29 = arith.constant 0 : index
    %c0_30 = arith.constant 0 : index
    %c0_31 = arith.constant 0 : index
    %80 = vector.load %arg12[%c0_29, %c0_30, %c0_31] : memref<1x8x32xf32, #tpu.memory_space<vmem>>, vector<1x8x32xf32>
    %81 = vector.shape_cast %80 : vector<1x8x32xf32> to vector<8x32xf32>
    %82 = vector.shape_cast %79 : vector<8x32xf32> to vector<1x8x32xf32>
    tpu.vector_store %arg12[%c0_29, %c0_30, %c0_31], %82 {strides = array<i32>} : memref<1x8x32xf32, #tpu.memory_space<vmem>>, vector<1x8x32xf32>,
    return
  }
  func.func @transform_0(%arg0: i32, %arg1: i32, %arg2: i32) -> (i32, i32, i32) {
    %c0_i32 = arith.constant 0 : i32
    %c0_i32_0 = arith.constant 0 : i32
    %c0_i32_1 = arith.constant 0 : i32
    return %arg0, %c0_i32, %c0_i32_0 : i32, i32, i32
  }
  func.func @transform_1(%arg0: i32, %arg1: i32, %arg2: i32) -> (i32, i32) {
    %c0_i32 = arith.constant 0 : i32
    %c0_i32_0 = arith.constant 0 : i32
    %c0_i32_1 = arith.constant 0 : i32
    return %c0_i32, %c0_i32_0 : i32, i32
  }
  func.func @transform_2(%arg0: i32, %arg1: i32, %arg2: i32) -> (i32, i32) {
    %c0_i32 = arith.constant 0 : i32
    %c0_i32_0 = arith.constant 0 : i32
    %c0_i32_1 = arith.constant 0 : i32
    return %c0_i32, %c0_i32_0 : i32, i32
  }
  func.func @transform_3(%arg0: i32, %arg1: i32, %arg2: i32) -> (i32, i32) {
    %c0_i32 = arith.constant 0 : i32
    %c0_i32_0 = arith.constant 0 : i32
    %c0_i32_1 = arith.constant 0 : i32
    return %c0_i32, %c0_i32_0 : i32, i32
  }
  func.func @transform_4(%arg0: i32, %arg1: i32, %arg2: i32) -> (i32, i32) {
    %c0_i32 = arith.constant 0 : i32
    %c0_i32_0 = arith.constant 0 : i32
    %c0_i32_1 = arith.constant 0 : i32
    return %c0_i32, %c0_i32_0 : i32, i32
  }
  func.func @transform_5(%arg0: i32, %arg1: i32, %arg2: i32) -> (i32, i32) {
    %c0_i32 = arith.constant 0 : i32
    %c0_i32_0 = arith.constant 0 : i32
    %c0_i32_1 = arith.constant 0 : i32
    return %c0_i32, %c0_i32_0 : i32, i32
  }
  func.func @transform_6(%arg0: i32, %arg1: i32, %arg2: i32) -> (i32, i32) {
    %c0_i32 = arith.constant 0 : i32
    %c0_i32_0 = arith.constant 0 : i32
    %c0_i32_1 = arith.constant 0 : i32
    return %c0_i32, %c0_i32_0 : i32, i32
  }
  func.func @transform_7(%arg0: i32, %arg1: i32, %arg2: i32) -> (i32, i32) {
    %c0_i32 = arith.constant 0 : i32
    %c0_i32_0 = arith.constant 0 : i32
    %c0_i32_1 = arith.constant 0 : i32
    return %c0_i32, %c0_i32_0 : i32, i32
  }
  func.func @transform_8(%arg0: i32, %arg1: i32, %arg2: i32) -> (i32, i32) {
    %c0_i32 = arith.constant 0 : i32
    %c0_i32_0 = arith.constant 0 : i32
    %c0_i32_1 = arith.constant 0 : i32
    return %c0_i32, %c0_i32_0 : i32, i32
  }
  func.func @transform_9(%arg0: i32, %arg1: i32, %arg2: i32) -> (i32, i32, i32) {
    %c1_i32 = arith.constant 1 : i32
    %0 = arith.muli %arg1, %c1_i32 : i32
    %1 = arith.addi %0, %arg2 : i32
    %c0_i32 = arith.constant 0 : i32
    %c0_i32_0 = arith.constant 0 : i32
    return %arg0, %1, %c0_i32 : i32, i32, i32
  }
}

</mosaic_0001>

<bundles_post_ra>
// kernel: tpu_custom_call.1
= control target key start
LH: loop header
LB: loop body
LE: loop exit
PB: predicated region body
PF: predicated region fallthrough
CT: control target
= control target key end

     0   :  { %s2267_s0 = inlined_call_operand.hbm [shape: bf16[2,8,32], index: 0, kind: input, shape index: {}]   ;;  %s2268_s1 = inlined_call_operand.hbm [shape: bf16[32,32], index: 1, kind: input, shape index: {}]   ;;  %s2269_s2 = inlined_call_operand.vmem [shape: f32[1,32], index: 2, kind: input, shape index: {}]   ;;  %s2270_s3 = inlined_call_operand.hbm [shape: bf16[32,32], index: 3, kind: input, shape index: {}]   ;;  %s2271_s4 = inlined_call_operand.vmem [shape: f32[1,32], index: 4, kind: input, shape index: {}]   ;;  %s2272_s5 = inlined_call_operand.vmem [shape: bf16[32,32], index: 5, kind: input, shape index: {}]   ;;  %s2273_s6 = inlined_call_operand.vmem [shape: f32[1,32], index: 6, kind: input, shape index: {}]   ;;  %s2274_s7 = inlined_call_operand.hbm [shape: bf16[32,32], index: 7, kind: input, shape index: {}]   ;;  %s2275_s8 = inlined_call_operand.vmem [shape: f32[1,32], index: 8, kind: input, shape index: {}]   ;;  %s2276_s9 = inlined_call_operand.hbm [shape: f32[2,8,32], index: 9, kind: output, shape index: {}]  }
   0x1   :  { %2298 = sst [smem:[#allocation23_spill]] %s2267_s0 }
   0x2   :  { %2299 = sst [smem:[#allocation24_spill]] %s2268_s1 }
   0x3   :  { %14 = vsyncpa [#allocation5], 0 }
   0x4   :  { %15 = vsyncpa [#allocation8], 0 }
   0x5   :  { %16 = vsyncpa [#allocation11], 0 }
   0x6   :  { %17 = vsyncpa [#allocation6], 0 }
   0x7   :  { %19 = vsyncpa [#allocation6 + $0x1], 0  ;;  %s1900_s30 = smov 0   ;;  %s1902_s10 = smov 0  }
   0x8   :  { %s1904_s11 = smov 0   ;;  %s1906_s12 = smov 0  }
   0x9   :  { %s1908_s13 = smov 0   ;;  %s1910_s14 = smov 0  }
   0xa LB: > { %2300 = sst [smem:[#allocation17_spill]] %s1813_s30  ;;  %s1835_s15 = smov [#allocation7]   ;;  %s1833_s14 = sphi %s1910_s14, %s25_s14   ;;  %s1829_s13 = sphi %s1908_s13, %s2333_s13   ;;  %s1825_s12 = sphi %s1906_s12, %s2332_s12   ;;  %s1821_s11 = sphi %s1904_s11, %s2331_s11   ;;  %s1817_s10 = sphi %s1902_s10, %s2335_s10   ;;  %s1813_s30 = sphi %s1900_s30, %s2334_s30  }
   0xb   : > { %2301 = sst [smem:[#allocation18_spill]] %s1821_s11  ;;  %s298_s16 = sshll.u32 %s1835_s15, 4  ;;  %s299_s16 = int_to_ptr.vmem [resolvable:$true] %s298_s16 }
   0xc   : > { %2302 = sst [smem:[#allocation19_spill]] %s1829_s13  ;;  %s1343_s17 = sadd.s32 4294967295, %s1833_s14  }
   0xd   : > { %p1345_p0 = scmp.ge.s32.totalorder %s1833_s14, 1  ;;  %p1934_p1 = scmp.eq.s32.totalorder %s1343_s17, 0 }
   0xe   : > { %p273_p2 = scmp.lt.s32.totalorder %s1833_s14, 3  ;;  %s2306_s1 = sld [smem:[#allocation24_spill]] }
   0xf   : > { %s2303_s18 = scalar_select %p1934_p1, 1, 0 }
  0x10   : > { %p1939_p3 = pnand %p1345_p0, %p273_p2 }
  0x12   : > { %s2304_s19 = scalar_select %p1939_p3, 1, 0 }
  0x13   : > { %p2277_p4 = pneg %p1939_p3 }
  0x14   : > { %s1629_s23 = scalar_lea.hbm %s2306_s1, 256 }
  0x15   : > { %p1950_p5 = pnand %p2277_p4, %p1934_p1  ;;  %p1630_p6 = scmp.ne.s32.totalorder %s2306_s1, %s1629_s23 }
  0x16   : > { %p1636_p10 = scmp.lt.u32.totalorder %s1629_s23, %s2306_s1 }
  0x17   : > { %s2305_s20 = scalar_select %p1950_p5, 1, 0 }
  0x18   : > { %p1962_p7 = pneg %p1950_p5 }
  0x1a   : > { %s2307_s26 = scalar_select %p1962_p7, 1, 0 }
  0x1b   : > { %p1632_p8 = pnand %p1962_p7, %p1630_p6 }
  0x1d   : > { %p1633_p9 = pneg %p1632_p8 }
  0x1f   : > { %p1638_p11 = pnand %p1636_p10, %p1633_p9 }
  0x21   : > { %1641 = shalt.err (!%p1638_p11)
}
  0x22   : > { %s1642_s29 = scalar_lea.vmem %s299_s16, 256  ;;  %p1650_p2 = scmp.lt.s32.totalorder %s299_s16, %s299_s16 }
  0x23   : > { %p1643_p12 = scmp.ne.s32.totalorder %s299_s16, %s1642_s29  ;;  %p1651_p4 = scmp.lt.s32.totalorder %s1642_s29, %s1642_s29 }
  0x25   : > { %p1645_p13 = pnand %p1643_p12, %p1962_p7  ;;  %p1652_p3 = por %p1651_p4, %p1650_p2 }
  0x27   : > { %p1646_p0 = pneg %p1645_p13 }
  0x29   : > { %p1653_p1 = pnand %p1652_p3, %p1646_p0 }
  0x2b   : > { %1656 = shalt.err (!%p1653_p1)
}
  0x2c   : > { %s2282_s15 = smov 64   ;;  %s2284_s21 = smov 4  }
  0x2d   : > { %1517 = dma.hbm_to_vmem [thread:$0]  (!%p1950_p5), %s2306_s1, 256, %s299_s16, [#allocation8], %s2282_s15, %s2282_s15, %s2284_s21  }
  0x2e   : > { %s1344_s24 = sadd.s32 4294967294, %s1833_s14   ;;  %s44_s25 = sadd.s32 1, %s1829_s13 }
  0x2f   : > { %p46_p1 = scmp.ge.s32.totalorder %s44_s25, 2  ;;  %s51_s27 = sadd.s32 1, %s1821_s11 }
  0x30   : > { %p64_p3 = scmp.ne.s32.totalorder %s1817_s10, %s1813_s30  ;;  %p259_p4 = scmp.ne.s32.totalorder %s1821_s11, %s1817_s10 }
  0x31   : > { %s2337_s25 = smov (%p46_p1, %s44_s25), 0  ;;  %p2309_p6 = scmp.ne.s32.totalorder %s2303_s18, 0 }
  0x32   : > { %2308 = sst [smem:[#allocation20_spill]] %s2337_s25  ;;  %p260_p9 = scmp.eq.s32.totalorder %s1343_s17, 1 }
  0x33   : > { %p1992_p8 = por %p2309_p6, %p64_p3  ;;  %s48_s16 = ssub.s32 %s1829_s13, %s2337_s25 }
  0x34   : > { %p266_p10 = scmp.eq.s32.totalorder %s1344_s24, 1  ;;  %p49_p11 = scmp.eq.s32.totalorder %s48_s16, 0 }
  0x35   : > { %s2310_s28 = scalar_select %p1992_p8, 1, 0 }
  0x36   : > { %p2000_p12 = por %p260_p9, %p259_p4  ;;  %p2004_p13 = por %p266_p10, %p64_p3 }
  0x37   : > { %s1346_s23 = sshll.u32 %s1825_s12, 6  ;;  %s2315_s0 = sld [smem:[#allocation23_spill]] }
  0x38   : > { %s2311_s29 = scalar_select %p2000_p12, 1, 0 }
  0x39   : > { %s2312_s22 = scalar_select %p2004_p13, 1, 0 }
  0x3a   : > { %s2010_s15 = scalar_select %p49_p11, %s1821_s11, %s51_s27  }
  0x3b   : > { %2313 = sst [smem:[#allocation21_spill]] %s2312_s22  ;;  %s1838_s17 = smov [#allocation4]  }
  0x3c   : > { %2314 = sst [smem:[#allocation22_spill]] %s2010_s15  ;;  %s288_s24 = sshll.u32 %s1838_s17, 4  ;;  %s289_s24 = int_to_ptr.vmem [resolvable:$true] %s288_s24 }
  0x3d   : > { %s2015_s30 = scalar_lea.hbm %s2315_s0, %s1346_s23  ;;  %p2316_p0 = scmp.ne.s32.totalorder %s2304_s19, 0 }
  0x3e   : > { %s1839_s27 = smov [#allocation9]   ;;  %s1657_s21 = scalar_lea.hbm %s2015_s30, 64 }
  0x3f   : > { %p2317_p2 = pneg %p2316_p0  ;;  %s314_s1 = sshll.u32 %s1839_s27, 4  ;;  %s315_s1 = int_to_ptr.vmem [resolvable:$true] %s314_s1 }
  0x40   : > { %p1658_p3 = scmp.ne.s32.totalorder %s2015_s30, %s1657_s21  ;;  %s1662_s25 = scalar_lea.hbm %s2315_s0, 128 }
  0x41   : > { %p2022_p1 = pnand %p2317_p2, %p1992_p8  ;;  %p1663_p10 = scmp.lt.u32.totalorder %s2015_s30, %s2315_s0 }
  0x42   : > { %p1664_p11 = scmp.lt.u32.totalorder %s1662_s25, %s1657_s21  ;;  %p1666_p13 = scmp.lt.u32.totalorder %s1657_s21, %s2015_s30 }
  0x43   : > { %p1659_p4 = pneg %p2022_p1 }
  0x44   : > { %p1665_p2 = por %p1664_p11, %p1663_p10 }
  0x45   : > { %p1660_p6 = pnand %p1659_p4, %p1658_p3 }
  0x46   : > { %p1667_p12 = por %p1666_p13, %p1665_p2 }
  0x47   : > { %p1661_p9 = pneg %p1660_p6 }
  0x49   : > { %p1668_p8 = pnand %p1667_p12, %p1661_p9 }
  0x4b   : > { %1671 = shalt.err (!%p1668_p8)
}
  0x4c   : > { %s1672_s27 = scalar_lea.vmem %s289_s24, 64  ;;  %p1680_p5 = scmp.lt.s32.totalorder %s289_s24, %s289_s24 }
  0x4d   : > { %p1673_p0 = scmp.ne.s32.totalorder %s289_s24, %s1672_s27  ;;  %p1681_p7 = scmp.lt.s32.totalorder %s1672_s27, %s1672_s27 }
  0x4f   : > { %p1675_p3 = pnand %p1673_p0, %p1659_p4  ;;  %p1682_p10 = por %p1681_p7, %p1680_p5 }
  0x51   : > { %p1676_p6 = pneg %p1675_p3 }
  0x53   : > { %p1683_p11 = pnand %p1682_p10, %p1676_p6 }
  0x55   : > { %1686 = shalt.err (!%p1683_p11)
}
  0x56   : > { %1514 = dma.hbm_to_vmem [thread:$0]  (!%p2022_p1), %s2015_s30, 64, %s289_s24, [#allocation5]  }
  0x57   : > { %s1687_s25 = scalar_lea.hbm %s2270_s3, 256  ;;  %p2319_p12 = scmp.ne.s32.totalorder %s2307_s26, 0 }
  0x58   : > { %p1688_p8 = scmp.ne.s32.totalorder %s2270_s3, %s1687_s25  ;;  %p1694_p5 = scmp.lt.u32.totalorder %s1687_s25, %s2270_s3 }
  0x5a   : > { %p1690_p13 = pnand %p1688_p8, %p2319_p12 }
  0x5c   : > { %p1691_p0 = pneg %p1690_p13 }
  0x5e   : > { %p1696_p7 = pnand %p1694_p5, %p1691_p0 }
  0x60   : > { %1699 = shalt.err (!%p1696_p7)
}
  0x61   : > { %s1700_s16 = scalar_lea.vmem %s315_s1, 256  ;;  %p1708_p2 = scmp.lt.s32.totalorder %s315_s1, %s315_s1 }
  0x62   : > { %p1701_p1 = scmp.ne.s32.totalorder %s315_s1, %s1700_s16  ;;  %p1709_p3 = scmp.lt.s32.totalorder %s1700_s16, %s1700_s16 }
  0x64   : > { %p1703_p4 = pnand %p1701_p1, %p2319_p12  ;;  %p1710_p6 = por %p1709_p3, %p1708_p2 }
  0x66   : > { %p1704_p9 = pneg %p1703_p4 }
  0x68   : > { %p1711_p10 = pnand %p1710_p6, %p1704_p9 }
  0x6a   : > { %1714 = shalt.err (!%p1711_p10)
}
  0x6b   : > { %p2320_p11 = scmp.ne.s32.totalorder %s2305_s20, 0  ;;  %s2321_s30 = smov 4  }
  0x6c   : > { %s2322_s24 = smov 64   ;;  %s1840_s25 = smov [#allocation10]  }
  0x6d   : > { %1520 = dma.hbm_to_vmem [thread:$0]  (!%p2320_p11), %s2270_s3, 256, %s315_s1, [#allocation8], %s2322_s24, %s2322_s24, %s2321_s30  }
  0x6e   : > { %s336_s21 = sshll.u32 %s1840_s25, 4  ;;  %s1715_s27 = scalar_lea.hbm %s2274_s7, 256  ;;  %s337_s21 = int_to_ptr.vmem [resolvable:$true] %s336_s21 }
  0x6f   : > { %p1716_p8 = scmp.ne.s32.totalorder %s2274_s7, %s1715_s27  ;;  %p1722_p5 = scmp.lt.u32.totalorder %s1715_s27, %s2274_s7 }
  0x71   : > { %p1718_p13 = pnand %p1716_p8, %p2319_p12 }
  0x73   : > { %p1719_p0 = pneg %p1718_p13 }
  0x75   : > { %p1724_p7 = pnand %p1722_p5, %p1719_p0 }
  0x77   : > { %1727 = shalt.err (!%p1724_p7)
}
  0x78   : > { %s1728_s1 = scalar_lea.vmem %s337_s21, 256  ;;  %p1736_p2 = scmp.lt.s32.totalorder %s337_s21, %s337_s21 }
  0x79   : > { %p1729_p1 = scmp.ne.s32.totalorder %s337_s21, %s1728_s1  ;;  %p1737_p3 = scmp.lt.s32.totalorder %s1728_s1, %s1728_s1 }
  0x7b   : > { %p1731_p4 = pnand %p1729_p1, %p2319_p12  ;;  %p1738_p6 = por %p1737_p3, %p1736_p2 }
  0x7d   : > { %p1732_p9 = pneg %p1731_p4 }
  0x7f   : > { %p1739_p10 = pnand %p1738_p6, %p1732_p9 }
  0x81   : > { %1742 = shalt.err (!%p1739_p10)
}
  0x82   : > { %1523 = dma.hbm_to_vmem [thread:$0]  (!%p2320_p11), %s2274_s7, 256, %s337_s21, [#allocation11], %s2322_s24, %s2322_s24, %s2321_s30  }
  0x83   : > { %p2323_p8 = scmp.ne.s32.totalorder %s2304_s19, 0 }
  0x84   : > { %p2324_p12 = scmp.ne.s32.totalorder (!%p2323_p8), %s2310_s28, 0 }
  0x85   : > { %355 = sbr.rel (%p2323_p8) target bundleno = 1454 (0x5ae), region = 56 }
  0x8c   : > { %1796 = dma.done.wait (%p2324_p12), [#allocation5], 64  }
  0x8d   : > { %1798 = vsyncadd (%p2324_p12), [#allocation5], 4294967232  ;;  %p2325_p13 = scmp.ne.s32.totalorder %s2303_s18, 0 }
  0x8f   : > { %1800 = dma.done.wait (%p2325_p13), [#allocation8], 512  }
  0x90   : > { %1802 = vsyncadd (%p2325_p13), [#allocation8], 4294966784 }
  0x91   : > { %1804 = dma.done.wait (%p2325_p13), [#allocation11], 256  }
  0x92   : > { %1806 = vsyncadd (%p2325_p13), [#allocation11], 4294967040  ;;  %v1841_v0 = vmov 0.0   ;;  %vm1842_vm0 = vmmov 0   ;;  %v1597_v1 = vld [vmem:[#allocation9] sm:$0xff]   ;;  %v1598_v2 = vld [vmem:[#allocation9 + $0x8] sm:$0xff]  }
  0x93   : > { %1415 = vmatprep.subr.bf16.mxu0 %v1841_v0  ;;  %1419 = vmatprep.mubr.msk.bf16.mxu0 %vm1842_vm0, %v1841_v0  ;;  %v404_v3 = vld [vmem:[#allocation4] sm:$0xf]  ;;  %vm428_vm1 = vcmask 261120   ;;  %v1599_v4 = vld [vmem:[#allocation7] sm:$0xff]   ;;  %v1600_v5 = vld [vmem:[#allocation7 + $0x8] sm:$0xff]   ;;  %vm537_vm2 = vcmask 60416  }
  0x94   : > { %1423 = vmatprep.subr.bf16.mxu1 %v1841_v0  ;;  %1427 = vmatprep.mubr.msk.bf16.mxu1 %vm1842_vm0, %v1841_v0  ;;  %v2115_v6 = vld [vmem:[#allocation4] sm:$0xf]  ;;  %v1601_v7 = vld [vmem:[%s2272_s5] sm:$0xff]   ;;  %v1602_v8 = vld [vmem:[%s2272_s5 + $0x8] sm:$0xff]   ;;  %s1843_s30 = smov 104   ;;  %s1844_s24 = smov 120  }
  0x95   : > { %1416 = vmatpush3.bf16.msra.mxu0 %v1597_v1  ;;  %1424 = vmatpush3.bf16.msra.mxu1 %v1601_v7  ;;  %v1355_v9 = vld [vmem:[%s2271_s4] ss:$0 sm:$0xff]  ;;  %s1845_s25 = smov 112   ;;  %vm681_vm3 = vcmask 64512   ;;  %vm933_vm4 = vcmask 1043456   ;;  %s1846_s17 = smov 8  }
  0x96   : > { %1417 = vmatprep.subr.bf16.mxu0 %v1841_v0  ;;  %1425 = vmatprep.subr.bf16.mxu1 %v1841_v0  ;;  %v1365_v16 = vld [vmem:[%s2269_s2] ss:$0 sm:$0xff]  ;;  %s1847_s27 = smov 16   ;;  %s1848_s16 = smov 24   ;;  %vm1141_vm5 = vcmask 130048   ;;  %vm1143_vm6 = vcmask 195584  }
  0x97   : > { %v1359_v25 = vld [vmem:[%s2273_s6] ss:$0 sm:$0xff]  ;;  %s395_s1 = sand.u32 1, %s1817_s10   ;;  %s1382_s19 = sshll.u32 %s1825_s12, 7 }
  0x98   : > { %s1354_s0 = sshll.u32 %s395_s1, 3  ;;  %p2326_p0 = scmp.ne.s32.totalorder %s2311_s29, 0 }
  0x99   : > { %1418 = vmatpush3.bf16.msra.mxu0 %v1598_v2  ;;  %1426 = vmatpush3.bf16.msra.mxu1 %v1602_v8  ;;  %s397_s20 = scalar_lea.vmem [#allocation12], %s1354_s0  ;;  %s1849_s12 = smov [#allocation12]  }
  0x9a   : > { %1431 = vmatprep.subr.bf16.mxu0 %v1841_v0  ;;  %1439 = vmatprep.subr.bf16.mxu1 %v1841_v0  ;;  %s1232_s26 = sshll.u32 %s397_s20, 4  ;;  %s1747_s15 = sshll.u32 %s1849_s12, 4  ;;  %s2221_s26 = int_to_ptr.vmem [resolvable:$true] %s1232_s26  ;;  %s1748_s15 = int_to_ptr.vmem [resolvable:$false] %s1747_s15 }
  0x9b   : > { %s1743_s13 = scalar_lea.vmem %s2221_s26, 128  ;;  %p1750_p1 = scmp.lt.s32.totalorder %s2221_s26, %s1748_s15 }
  0x9c   : > { %1420 = vmatmul.mubr.msk.bf16.vlgmr.msra.gmra.mrb[0].mxu0 %vm428_vm1, %v404_v3  ;;  %1428 = vmatmul.mubr.msk.bf16.vlgmr.msra.gmra.mrb[0].mxu1 %vm428_vm1, %v404_v3  ;;  %p1744_p11 = scmp.ne.s32.totalorder %s2221_s26, %s1743_s13 }
  0x9d   : > { %1432 = vmatpush3.bf16.msra.mxu0 %v1599_v4  ;;  %1435 = vmatprep.mubr.msk.bf16.mxu0 %vm1842_vm0, %v1841_v0 }
  0x9e   : > { %1433 = vmatprep.subr.bf16.mxu0 %v1841_v0  ;;  %1441 = vmatprep.mubr.msk.bf16.mxu1 %vm1842_vm0, %v1841_v0  ;;  %p1745_p5 = pnand %p1744_p11, %p2326_p0 }
  0xa0   : > { %p1746_p7 = pneg %p1745_p5 }
  0xa1   : > { %1434 = vmatpush3.bf16.msra.mxu0 %v1600_v5 }
  0xa2   : > { %1445 = vmatprep.subr.bf16.mxu0 %v1841_v0 }
  0xa4   : > { %1436 = vmatmul.mubr.msk.bf16.vlgmr.msra.gmra.mrb[4].mxu0 %vm428_vm1, %v2115_v6 }
  0xa5   : > { %1447 = vmatprep.mubr.msk.bf16.mxu0 %vm1842_vm0, %v1841_v0 }
 0x16f   : > { %v466_v10 = vpop.f32.mrb[0].mxu0  ;;  %v530_v26 = vpop.f32.mrb[0].mxu1 }
 0x170   : > { %v467_v11 = vadd.f32 %v1355_v9, %v466_v10  ;;  %v1421_v12 = vpop.f32.mrb[1].mxu0  ;;  %v531_v27 = vadd.f32 %v1359_v25, %v530_v26  ;;  %v1429_v28 = vpop.f32.mrb[1].mxu1 }
 0x171   : > { %v469_v13 = vpop.f32.mrb[2].mxu0  ;;  %v533_v29 = vpop.f32.mrb[2].mxu1 }
 0x172   : > { %v472_v14 = vpack.c.bf16 %v467_v11, %v467_v11  ;;  %v1422_v15 = vpop.f32.mrb[3].mxu0  ;;  %v2152_v30 = vpack.c.bf16 %v531_v27, %v531_v27  ;;  %v1430_v31 = vpop.f32.mrb[3].mxu1 }
 0x174   : > { %538 = vst.msk [vmem:[#allocation2] sm:$0xf] %vm537_vm2, %v472_v14  ;;  %572 = vrot.lane.b32.xlu1 %v472_v14, %s1843_s30  ;;  %543 = vrot.lane.b32.xlu0 %v472_v14, %s1844_s24  ;;  %539 = vst.msk [vmem:[#allocation3] sm:$0xf] %vm537_vm2, %v2152_v30 }
 0x177   : > { %v653_v17 = vpop.f32.mrb[4].mxu0 }
 0x178   : > { %559 = vrot.lane.b32.xlu0 %v472_v14, %s1845_s25  ;;  %v654_v18 = vadd.f32 %v1365_v16, %v653_v17  ;;  %v1437_v19 = vpop.f32.mrb[5].mxu0 }
 0x179   : > { %v656_v20 = vpop.f32.mrb[6].mxu0 }
 0x17a   : > { %660 = vrot.lane.b32.xlu1 %v654_v18, %s1844_s24  ;;  %v1438_v21 = vpop.f32.mrb[7].mxu0  ;;  %v669_v24 = vpack.c.bf16 %v654_v18, %v654_v18 }
 0x17b   : > { %v673_v22 = vld [vmem:[#allocation2] sm:$0xf]  ;;  %v677_v43 = vld [vmem:[#allocation3] sm:$0xf] }
 0x17c   : > { %v686_v23 = vsel %vm681_vm3, %v673_v22, 0  ;;  %663 = vrot.lane.b32.xlu0 %v654_v18, %s1845_s25  ;;  %v935_v46 = vsel %vm933_vm4, %v677_v43, 0 }
 0x17d   : > { %1440 = vmatpush3.bf16.xpose.msra.mxu1 %v686_v23 }
 0x17e   : > { %666 = vrot.lane.b32.xlu1 %v654_v18, %s1843_s30  ;;  %1451 = vmatprep.subr.bf16.mxu1 %v1841_v0 }
 0x182   : > { %553 = vrot.lane.b32.xlu1 %v2152_v30, %s1844_s24  ;;  %s1217_s24 = scalar_lea.sflag [#allocation6], %s395_s1 }
 0x184   : > { %1442 = vmatmul.mubr.msk.bf16.vlgmr.msra.gmra.mrb[4].mxu1 %vm681_vm3, %v669_v24 }
 0x185   : > { %1453 = vmatprep.mubr.msk.bf16.mxu1 %vm1842_vm0, %v1841_v0 }
 0x1e6   : > { %v573_v32 = vpop.permute.xlu1 %572  ;;  %v544_v33 = vpop.permute.xlu0 %543 }
 0x1e7   : > { %578 = vst.msk [vmem:[#allocation2 + $0xc] sm:$0xf] %vm537_vm2, %v573_v32  ;;  %549 = vst.msk [vmem:[#allocation2 + $0x4] sm:$0xf] %vm537_vm2, %v544_v33 }
 0x1ea   : > { %v560_v34 = vpop.permute.xlu0 %559 }
 0x1eb   : > { %565 = vst.msk [vmem:[#allocation2 + $0x8] sm:$0xf] %vm537_vm2, %v560_v34 }
 0x1ec   : > { %v661_v37 = vpop.permute.xlu1 %660 }
 0x1ed   : > { %v670_v39 = vpack.c.bf16 %v661_v37, %v661_v37 }
 0x1ee   : > { %v674_v35 = vld [vmem:[#allocation2 + $0x4] sm:$0xf]  ;;  %v676_v41 = vld [vmem:[#allocation2 + $0xc] sm:$0xf]  ;;  %v664_v42 = vpop.permute.xlu0 %663 }
 0x1ef   : > { %v732_v36 = vsel %vm681_vm3, %v674_v35, 0  ;;  %v824_v44 = vsel %vm681_vm3, %v676_v41, 0  ;;  %v671_v45 = vpack.c.bf16 %v664_v42, %v664_v42 }
 0x1f0   : > { %1446 = vmatpush3.bf16.xpose.msra.mxu0 %v732_v36  ;;  %v667_v47 = vpop.permute.xlu1 %666 }
 0x1f1   : > { %1457 = vmatprep.subr.bf16.mxu0 %v1841_v0  ;;  %v672_v48 = vpack.c.bf16 %v667_v47, %v667_v47 }
 0x1f2   : > { %v675_v38 = vld [vmem:[#allocation2 + $0x8] sm:$0xf] }
 0x1f3   : > { %v778_v40 = vsel %vm681_vm3, %v675_v38, 0 }
 0x1f4   : > { %1452 = vmatpush3.bf16.xpose.msra.mxu1 %v778_v40  ;;  %v554_v54 = vpop.permute.xlu1 %553 }
 0x1f5   : > { %1463 = vmatprep.subr.bf16.mxu1 %v1841_v0  ;;  %558 = vst.msk [vmem:[#allocation3 + $0x4] sm:$0xf] %vm537_vm2, %v554_v54 }
 0x1f7   : > { %1448 = vmatmul.mubr.msk.bf16.vlgmr.msra.gmra.mrb[8].mxu0 %vm681_vm3, %v670_v39 }
 0x1f8   : > { %1458 = vmatpush3.bf16.xpose.msra.mxu0 %v824_v44  ;;  %1459 = vmatprep.mubr.msk.bf16.mxu0 %vm1842_vm0, %v1841_v0 }
 0x1f9   : > { %1469 = vmatprep.subr.bf16.mxu0 %v1841_v0 }
 0x1fb   : > { %1454 = vmatmul.mubr.msk.bf16.vlgmr.msra.gmra.mrb[8].mxu1 %vm681_vm3, %v671_v45 }
 0x1fc   : > { %1464 = vmatpush3.bf16.msra.mxu1 %v935_v46  ;;  %1465 = vmatprep.mubr.msk.bf16.mxu1 %vm1842_vm0, %v1841_v0  ;;  %v678_v55 = vld [vmem:[#allocation3 + $0x4] sm:$0xf] }
 0x1fd   : > { %1475 = vmatprep.subr.bf16.mxu1 %v1841_v0  ;;  %v981_v56 = vsel %vm933_vm4, %v678_v55, 0 }
 0x1ff   : > { %1460 = vmatmul.mubr.msk.bf16.vlgmr.msra.gmra.mrb[12].mxu0 %vm681_vm3, %v672_v48 }
 0x200   : > { %1471 = vmatprep.mubr.msk.bf16.mxu0 %vm1842_vm0, %v1841_v0  ;;  %1470 = vmatpush3.bf16.msra.mxu0 %v981_v56 }
 0x201   : > { %1481 = vmatprep.subr.bf16.mxu0 %v1841_v0 }
 0x257   : > { %v722_v49 = vpop.f32.mrb[4].mxu1 }
 0x258   : > { %v1443_v50 = vpop.f32.mrb[5].mxu1  ;;  %v866_v51 = vsel %vm681_vm3, %v722_v49, -inf }
 0x259   : > { %867 = vmax.xlane.f32.xlu0 %v866_v51  ;;  %v725_v52 = vpop.f32.mrb[6].mxu1 }
 0x25a   : > { %v1444_v53 = vpop.f32.mrb[7].mxu1 }
 0x2ca   : > { %v768_v57 = vpop.f32.mrb[8].mxu0 }
 0x2cb   : > { %v1449_v58 = vpop.f32.mrb[9].mxu0  ;;  %v869_v59 = vsel %vm681_vm3, %v768_v57, -inf }
 0x2cc   : > { %870 = vmax.xlane.f32.xlu1 %v869_v59  ;;  %v771_v60 = vpop.f32.mrb[10].mxu0 }
 0x2cd   : > { %v1450_v61 = vpop.f32.mrb[11].mxu0 }
 0x2ce   : > { %v814_v62 = vpop.f32.mrb[8].mxu1 }
 0x2cf   : > { %v1455_v63 = vpop.f32.mrb[9].mxu1  ;;  %v872_v1 = vsel %vm681_vm3, %v814_v62, -inf }
 0x2d0   : > { %873 = vmax.xlane.f32.xlu0 %v872_v1  ;;  %v817_v2 = vpop.f32.mrb[10].mxu1 }
 0x2d1   : > { %v1456_v3 = vpop.f32.mrb[11].mxu1 }
 0x2d2   : > { %v860_v4 = vpop.f32.mrb[12].mxu0 }
 0x2d3   : > { %v1461_v5 = vpop.f32.mrb[13].mxu0  ;;  %v875_v7 = vsel %vm681_vm3, %v860_v4, -inf }
 0x2d4   : > { %876 = vmax.xlane.f32.xlu0 %v875_v7  ;;  %v863_v8 = vpop.f32.mrb[14].mxu0 }
 0x2d5   : > { %v1462_v9 = vpop.f32.mrb[15].mxu0 }
 0x2dd   : > { %579 = vrot.lane.b32.xlu1 %v2152_v30, %s1843_s30  ;;  %s2219_s30 = scalar_lea.hbm %s2276_s9, %s1382_s19 }
 0x2e6   : > { %v868_v10 = vpop.xlane.xlu0 %867 }
 0x2e7   : > { %v878_v11 = vmax.f32 %v868_v10, -1e+30 }
 0x2e9   : > { %v894_v12 = vsub.f32 %v722_v49, %v878_v11  ;;  %v882_v44 = vsub.f32 -1e+30, %v878_v11 }
 0x2ea   : > { %566 = vrot.lane.b32.xlu0 %v2152_v30, %s1845_s25  ;;  %s1749_s25 = scalar_lea.vmem %s1748_s15, 256 }
 0x2eb   : > { %v898_v13 = vmul.f32 1.442695, %v894_v12  ;;  %v886_v45 = vmul.f32 1.442695, %v882_v44  ;;  %v1377_v44 = vld [vmem:[%s2275_s8] ss:$0 sm:$0xff]  ;;  %p1751_p4 = scmp.lt.s32.totalorder %s1749_s25, %s1743_s13 }
 0x2ed   : > { %1605 = vpow2.f32 %v898_v13  ;;  %v1603_v13 = vld [vmem:[#allocation10] sm:$0xff]   ;;  %p1752_p9 = por %p1751_p4, %p1750_p1 }
 0x2ef   : > { %p1753_p2 = pnand %p1752_p9, %p1746_p7 }
 0x2f7   : > { %v1606_v14 = vpop.eup %1605 }
 0x2f8   : > { %v926_v15 = vpack.c.bf16 %v1606_v14, %v1606_v14  ;;  %v910_v38 = vsel %vm681_vm3, %v1606_v14, 0.0 }
 0x2fa   : > { %1466 = vmatmul.mubr.msk.bf16.vlgmr.msra.gmra.mrb[12].mxu1 %vm681_vm3, %v926_v15 }
 0x2fb   : > { %1477 = vmatprep.mubr.msk.bf16.mxu1 %vm1842_vm0, %v1841_v0 }
 0x359   : > { %v871_v16 = vpop.xlane.xlu1 %870 }
 0x35a   : > { %v879_v17 = vmax.f32 %v871_v16, -1e+30 }
 0x35c   : > { %v895_v18 = vsub.f32 %v768_v57, %v879_v17  ;;  %v883_v58 = vsub.f32 -1e+30, %v879_v17 }
 0x35d   : > { %v874_v19 = vpop.xlane.xlu0 %873  ;;  %v580_v20 = vpop.permute.xlu1 %579 }
 0x35e   : > { %v900_v21 = vmul.f32 1.442695, %v895_v18  ;;  %v880_v22 = vmax.f32 %v874_v19, -1e+30  ;;  %584 = vst.msk [vmem:[#allocation3 + $0xc] sm:$0xf] %vm537_vm2, %v580_v20 }
 0x35f   : > { %v888_v59 = vmul.f32 1.442695, %v883_v58  ;;  %v1604_v19 = vld [vmem:[#allocation10 + $0x8] sm:$0xff]  }
 0x360   : > { %v896_v23 = vsub.f32 %v814_v62, %v880_v22  ;;  %1607 = vpow2.f32 %v900_v21  ;;  %v884_v60 = vsub.f32 -1e+30, %v880_v22 }
 0x361   : > { %v877_v24 = vpop.xlane.xlu0 %876 }
 0x362   : > { %v902_v25 = vmul.f32 1.442695, %v896_v23  ;;  %v881_v26 = vmax.f32 %v877_v24, -1e+30  ;;  %v890_v61 = vmul.f32 1.442695, %v884_v60 }
 0x364   : > { %v897_v27 = vsub.f32 %v860_v4, %v881_v26  ;;  %1609 = vpow2.f32 %v902_v25  ;;  %v885_v62 = vsub.f32 -1e+30, %v881_v26 }
 0x365   : > { %v567_v28 = vpop.permute.xlu0 %566  ;;  %v680_v31 = vld [vmem:[#allocation3 + $0xc] sm:$0xf] }
 0x366   : > { %v904_v29 = vmul.f32 1.442695, %v897_v27  ;;  %571 = vst.msk [vmem:[#allocation3 + $0x8] sm:$0xf] %vm537_vm2, %v567_v28  ;;  %v1073_v35 = vsel %vm933_vm4, %v680_v31, 0 }
 0x367   : > { %v892_v63 = vmul.f32 1.442695, %v885_v62 }
 0x368   : > { %1611 = vpow2.f32 %v904_v29 }
 0x369   : > { %1613 = vpow2.f32 %v886_v45 }
 0x36a   : > { %v1608_v30 = vpop.eup %1607 }
 0x36b   : > { %v913_v32 = vsel %vm681_vm3, %v1608_v30, 0.0  ;;  %v927_v33 = vpack.c.bf16 %v1608_v30, %v1608_v30 }
 0x36c   : > { %914 = vadd.xlane.f32.xlu1 %v913_v32 }
 0x36d   : > { %v679_v34 = vld [vmem:[#allocation3 + $0x8] sm:$0xf]  ;;  %1472 = vmatmul.mubr.msk.bf16.vlgmr.msra.gmra.mrb[16].mxu0 %vm681_vm3, %v927_v33 }
 0x36e   : > { %v1027_v36 = vsel %vm933_vm4, %v679_v34, 0  ;;  %v1610_v37 = vpop.eup %1609  ;;  %1482 = vmatpush3.bf16.msra.mxu0 %v1073_v35  ;;  %1483 = vmatprep.mubr.msk.bf16.mxu0 %vm1842_vm0, %v1841_v0 }
 0x36f   : > { %1476 = vmatpush3.bf16.msra.mxu1 %v1027_v36  ;;  %v916_v39 = vsel %vm681_vm3, %v1610_v37, 0.0  ;;  %v928_v40 = vpack.c.bf16 %v1610_v37, %v1610_v37  ;;  %v1127_v37 = vunpack.c.l.bf16 %v2115_v6 }
 0x370   : > { %1487 = vmatprep.subr.bf16.mxu1 %v1841_v0  ;;  %911 = vadd.xlane.f32.xlu1 %v910_v38 }
 0x371   : > { %917 = vadd.xlane.f32.xlu0 %v916_v39 }
 0x372   : > { %1478 = vmatmul.mubr.msk.bf16.vlgmr.msra.gmra.mrb[16].mxu1 %vm681_vm3, %v928_v40  ;;  %v1612_v41 = vpop.eup %1611 }
 0x373   : > { %1491 = vmatprep.mubr.msk.bf16.mxu1 %vm1842_vm0, %v1841_v0  ;;  %v919_v42 = vsel %vm681_vm3, %v1612_v41, 0.0  ;;  %v929_v43 = vpack.c.bf16 %v1612_v41, %v1612_v41  ;;  %v1614_v46 = vpop.eup %1613  ;;  %1488 = vmatpush3.bf16.msra.mxu1 %v1603_v13 }
 0x374   : > { %v906_v47 = vmul.f32 0.0, %v1614_v46  ;;  %1489 = vmatprep.subr.bf16.mxu1 %v1841_v0 }
 0x375   : > { %920 = vadd.xlane.f32.xlu0 %v919_v42  ;;  %1484 = vmatmul.mubr.msk.bf16.vlgmr.msra.gmra.mrb[20].mxu0 %vm681_vm3, %v929_v43 }
 0x377   : > { %1490 = vmatpush3.bf16.msra.mxu1 %v1604_v19 }
 0x3cd   : > { %v971_v48 = vpop.f32.mrb[12].mxu1 }
 0x3ce   : > { %v1115_v49 = vadd.f32 %v971_v48, %v906_v47  ;;  %v1467_v50 = vpop.f32.mrb[13].mxu1 }
 0x3cf   : > { %v974_v51 = vpop.f32.mrb[14].mxu1 }
 0x3d0   : > { %v1468_v52 = vpop.f32.mrb[15].mxu1 }
 0x3f9   : > { %v915_v53 = vpop.xlane.xlu1 %914 }
 0x3fd   : > { %v912_v54 = vpop.xlane.xlu1 %911 }
 0x3fe   : > { %v922_v55 = vadd.f32 %v912_v54, %v906_v47  ;;  %v918_v4 = vpop.xlane.xlu0 %917 }
 0x400   : > { %1615 = vrcp.f32 %v922_v55 }
 0x401   : > { %1617 = vpow2.f32 %v888_v59 }
 0x402   : > { %1619 = vpow2.f32 %v890_v61  ;;  %v921_v10 = vpop.xlane.xlu0 %920 }
 0x403   : > { %1621 = vpow2.f32 %v892_v63 }
 0x40a   : > { %v1616_v56 = vpop.eup %1615 }
 0x40b   : > { %v1123_v57 = vmul.f32 %v1616_v56, %v1115_v49  ;;  %v1618_v1 = vpop.eup %1617 }
 0x40c   : > { %v907_v2 = vmul.f32 0.0, %v1618_v1  ;;  %v1620_v3 = vpop.eup %1619 }
 0x40d   : > { %v908_v7 = vmul.f32 0.0, %v1620_v3  ;;  %v1622_v8 = vpop.eup %1621 }
 0x40e   : > { %v923_v5 = vadd.f32 %v915_v53, %v907_v2  ;;  %v909_v11 = vmul.f32 0.0, %v1622_v8 }
 0x40f   : > { %v924_v9 = vadd.f32 %v918_v4, %v908_v7 }
 0x410   : > { %1623 = vrcp.f32 %v923_v5  ;;  %v925_v12 = vadd.f32 %v921_v10, %v909_v11 }
 0x411   : > { %1625 = vrcp.f32 %v924_v9 }
 0x412   : > { %1627 = vrcp.f32 %v925_v12 }
 0x41a   : > { %v1624_v17 = vpop.eup %1623 }
 0x41b   : > { %v1626_v25 = vpop.eup %1625 }
 0x41c   : > { %v1628_v31 = vpop.eup %1627 }
 0x440   : > { %v1017_v14 = vpop.f32.mrb[16].mxu0 }
 0x441   : > { %v1116_v15 = vadd.f32 %v1017_v14, %v907_v2  ;;  %v1473_v16 = vpop.f32.mrb[17].mxu0 }
 0x442   : > { %v1020_v18 = vpop.f32.mrb[18].mxu0 }
 0x443   : > { %v1124_v20 = vmul.f32 %v1624_v17, %v1116_v15  ;;  %v1474_v21 = vpop.f32.mrb[19].mxu0 }
 0x445   : > { %v1063_v22 = vpop.f32.mrb[16].mxu1  ;;  %1129 = vrot.lane.b32.xlu0 %v1124_v20, %s1846_s17 }
 0x446   : > { %v1117_v23 = vadd.f32 %v1063_v22, %v908_v7  ;;  %v1479_v24 = vpop.f32.mrb[17].mxu1 }
 0x447   : > { %v1066_v26 = vpop.f32.mrb[18].mxu1 }
 0x448   : > { %v1125_v27 = vmul.f32 %v1626_v25, %v1117_v23  ;;  %v1480_v28 = vpop.f32.mrb[19].mxu1  ;;  %v1109_v0 = vpop.f32.mrb[20].mxu0 }
 0x449   : > { %v1118_v29 = vadd.f32 %v1109_v0, %v909_v11  ;;  %v1485_v30 = vpop.f32.mrb[21].mxu0 }
 0x44a   : > { %1133 = vrot.lane.b32.xlu1 %v1125_v27, %s1847_s27  ;;  %v1112_v32 = vpop.f32.mrb[22].mxu0 }
 0x44b   : > { %v1126_v33 = vmul.f32 %v1628_v31, %v1118_v29  ;;  %v1486_v34 = vpop.f32.mrb[23].mxu0 }
 0x44e   : > { %1137 = vrot.lane.b32.xlu1 %v1126_v33, %s1848_s16 }
 0x4b7   : > { %v1130_v35 = vpop.permute.xlu0 %1129 }
 0x4b8   : > { %v1140_v38 = vsel %vm681_vm3, %v1123_v57, %v1130_v35 }
 0x4bc   : > { %v1134_v36 = vpop.permute.xlu1 %1133 }
 0x4bd   : > { %v1142_v39 = vsel %vm1141_vm5, %v1140_v38, %v1134_v36 }
 0x4c0   : > { %v1138_v40 = vpop.permute.xlu1 %1137 }
 0x4c1   : > { %v1144_v41 = vsel %vm1143_vm6, %v1142_v39, %v1138_v40 }
 0x4c2   : > { %v1145_v42 = vadd.f32 %v1144_v41, %v1127_v37 }
 0x4c4   : > { %v1146_v43 = vpack.c.bf16 %v1145_v42, %v1145_v42 }
 0x4c6   : > { %1492 = vmatmul.mubr.msk.bf16.vlgmr.msra.gmra.mrb[20].mxu1 %vm428_vm1, %v1146_v43 }
 0x599   : > { %v1207_v45 = vpop.f32.mrb[20].mxu1 }
 0x59a   : > { %v1208_v6 = vadd.f32 %v1377_v44, %v1207_v45  ;;  %v1493_v46 = vpop.f32.mrb[21].mxu1 }
 0x59b   : > { %v1210_v47 = vpop.f32.mrb[22].mxu1 }
 0x59c   : > { %v1213_v48 = vmax.f32 %v1208_v6, 0.0  ;;  %v1494_v49 = vpop.f32.mrb[23].mxu1 }
 0x59e   : > { %v1214_v50 = vadd.f32 %v1213_v48, %v1145_v42 }
 0x5a0   : > { %1215 = vst.msk [vmem:[%s397_s20] sm:$0xff] %vm428_vm1, %v1214_v50 }
 0x5a1   : > { %1756 = shalt.err (!%p1753_p2)
}
 0x5a2   : > { %s1757_s21 = scalar_lea.hbm %s2219_s30, 128  ;;  %s1761_s27 = scalar_lea.hbm %s2276_s9, 256 }
 0x5a3   : > { %p1758_p3 = scmp.ne.s32.totalorder %s2219_s30, %s1757_s21  ;;  %p1762_p8 = scmp.lt.u32.totalorder %s2219_s30, %s2276_s9 }
 0x5a4   : > { %p1763_p12 = scmp.lt.u32.totalorder %s1761_s27, %s1757_s21  ;;  %p1765_p11 = scmp.lt.u32.totalorder %s1757_s21, %s2219_s30 }
 0x5a5   : > { %p1759_p6 = pnand %p1758_p3, %p2326_p0 }
 0x5a6   : > { %p1764_p13 = por %p1763_p12, %p1762_p8 }
 0x5a7   : > { %p1760_p10 = pneg %p1759_p6 }
 0x5a8   : > { %p1766_p5 = por %p1765_p11, %p1764_p13 }
 0x5aa   : > { %p1767_p7 = pnand %p1766_p5, %p1760_p10 }
 0x5ac   : > { %1770 = shalt.err (!%p1767_p7)
}
 0x5ad   : > { %1509 = dma.vmem_to_hbm [thread:$0]  (%p2326_p0), %s2221_s26, 128, %s2219_s30, %s1217_s24  }
 0x5ae PF: > { %s2327_s0 = sld [smem:[#allocation17_spill]]  ;;  %s2328_s11 = sld [smem:[#allocation21_spill]] }
 0x5af   : > { %p1534_p1 = scmp.ge.s32.totalorder %s1833_s14, 2 }
 0x5b4   : > { %s1244_s18 = sand.u32 1, %s2327_s0   ;;  %p2329_p4 = scmp.ne.s32.totalorder %s2328_s11, 0 }
 0x5b5   : > { %s1245_s19 = scalar_lea.sflag [#allocation6], %s1244_s18 }
 0x5b6   : > { %p1525_p9 = pnand %p1534_p1, %p2329_p4 }
 0x5b8   : > { %1808 = dma.done.wait (!%p1525_p9), %s1245_s19, 128  }
 0x5b9   : > { %1810 = vsyncadd (!%p1525_p9), %s1245_s19, 4294967168  ;;  %s25_s14 = sadd.s32 1, %s1833_s14   ;;  %s2330_s20 = sld [smem:[#allocation18_spill]] }
 0x5ba   : > { %p22_p2 = scmp.ge.s32.totalorder %s25_s14, 4   ;;  %s2331_s11 = sld [smem:[#allocation22_spill]] }
 0x5bb   : > { %s2332_s12 = sld [smem:[#allocation19_spill]]  ;;  %s2333_s13 = sld [smem:[#allocation20_spill]] }
 0x5bc   : > { %s2334_s30 = smov %s1817_s10  ;;  %24 = sbr.rel (!%p22_p2) target bundleno = 10 (0xa), region = 117 }
 0x5bf   : > { %s2335_s10 = smov %s2330_s20 }
 0x5c3   :  { %1250 = vsyncpa [#allocation5], 1 }
 0x5c4   :  { %1252 = vsyncpa [#allocation5 + $0x1], 1 }
 0x5c5   :  { %1253 = vsyncpa [#allocation8], 1 }
 0x5c6   :  { %1254 = vsyncpa [#allocation11], 1 }
 0x5c7   :  { %1255 = vsyncpa [#allocation6], 1 }
 0x5c8   :  { %1257 = vsyncpa [#allocation6 + $0x1], 1 }

// kernel: tpu_custom_call.1
= control target key start
LH: loop header
LB: loop body
LE: loop exit
PB: predicated region body
PF: predicated region fallthrough
CT: control target
= control target key end

     0   :  { %s2327_s0 = inlined_call_operand.hbm [shape: bf16[2,8,32], index: 0, kind: input, shape index: {}]   ;;  %s2328_s1 = inlined_call_operand.hbm [shape: bf16[32,32], index: 1, kind: input, shape index: {}]   ;;  %s2329_s2 = inlined_call_operand.vmem [shape: f32[1,32], index: 2, kind: input, shape index: {}]   ;;  %s2330_s3 = inlined_call_operand.hbm [shape: bf16[32,32], index: 3, kind: input, shape index: {}]   ;;  %s2331_s4 = inlined_call_operand.vmem [shape: f32[1,32], index: 4, kind: input, shape index: {}]   ;;  %s2332_s5 = inlined_call_operand.vmem [shape: bf16[32,32], index: 5, kind: input, shape index: {}]   ;;  %s2333_s6 = inlined_call_operand.vmem [shape: f32[1,32], index: 6, kind: input, shape index: {}]   ;;  %s2334_s7 = inlined_call_operand.hbm [shape: bf16[32,32], index: 7, kind: input, shape index: {}]   ;;  %s2335_s8 = inlined_call_operand.vmem [shape: f32[1,32], index: 8, kind: input, shape index: {}]   ;;  %s2336_s9 = inlined_call_operand.hbm [shape: f32[2,8,32], index: 9, kind: output, shape index: {}]  }
   0x1   :  { %2344 = sst [smem:[#allocation20_spill]] %s2333_s6 }
   0x2   :  { %2345 = sst [smem:[#allocation21_spill]] %s2335_s8 }
   0x3   :  { %2346 = sst [smem:[#allocation22_spill]] %s2336_s9 }
   0x4   :  { %14 = vsyncpa [#allocation5], 0 }
   0x5   :  { %16 = vsyncpa [#allocation5 + $0x1], 0 }
   0x6   :  { %17 = vsyncpa [#allocation8], 0 }
   0x7   :  { %18 = vsyncpa [#allocation11], 0 }
   0x8   :  { %19 = vsyncpa [#allocation6], 0 }
   0x9   :  { %21 = vsyncpa [#allocation6 + $0x1], 0  ;;  %s1930_s30 = smov 0   ;;  %s1932_s10 = smov 0  }
   0xa   :  { %s1934_s11 = smov 0   ;;  %s1936_s12 = smov 0  }
   0xb   :  { %s1938_s13 = smov 0   ;;  %s1940_s14 = smov 0  }
   0xc LB: > { %2347 = sst [smem:[#allocation17_spill]] %s1843_s30  ;;  %s1369_s15 = sadd.s32 4294967295, %s1863_s14   ;;  %s1863_s14 = sphi %s1940_s14, %s27_s14   ;;  %s1859_s13 = sphi %s1938_s13, %s2375_s13   ;;  %s1855_s12 = sphi %s1936_s12, %s2374_s12   ;;  %s1851_s11 = sphi %s1934_s11, %s2373_s11   ;;  %s1847_s10 = sphi %s1932_s10, %s2372_s10   ;;  %s1843_s30 = sphi %s1930_s30, %s2371_s30  }
   0xd   : > { %2348 = sst [smem:[#allocation18_spill]] %s1855_s12  ;;  %s1370_s16 = sadd.s32 4294967294, %s1863_s14  }
   0xe   : > { %p66_p0 = scmp.ne.s32.totalorder %s1847_s10, %s1843_s30  ;;  %p1964_p1 = scmp.eq.s32.totalorder %s1369_s15, 0 }
   0xf   : > { %p1968_p2 = scmp.eq.s32.totalorder %s1369_s15, 1  ;;  %p268_p3 = scmp.eq.s32.totalorder %s1370_s16, 1 }
  0x10   : > { %s2349_s17 = scalar_select %p1964_p1, 1, 0 }
  0x11   : > { %s2350_s18 = scalar_select %p1968_p2, 1, 0 }
  0x12   : > { %p1974_p4 = por %p1964_p1, %p66_p0  ;;  %p1371_p5 = scmp.ge.s32.totalorder %s1863_s14, 1 }
  0x13   : > { %p1979_p6 = por %p268_p3, %p66_p0  ;;  %p275_p7 = scmp.lt.s32.totalorder %s1863_s14, 3 }
  0x14   : > { %s2351_s19 = scalar_select %p1974_p4, 1, 0 }
  0x15   : > { %s2352_s20 = scalar_select %p1979_p6, 1, 0 }
  0x16   : > { %p1984_p8 = pnand %p1371_p5, %p275_p7  ;;  %s1865_s22 = smov [#allocation7]  }
  0x17   : > { %2353 = sst [smem:[#allocation19_spill]] %s2352_s20  ;;  %s287_s23 = sshll.u32 %s1865_s22, 4  ;;  %s1988_s23 = int_to_ptr.vmem [resolvable:$true] %s287_s23 }
  0x18   : > { %s2354_s21 = scalar_select %p1984_p8, 1, 0 }
  0x19   : > { %p1540_p9 = pneg %p1984_p8  ;;  %s1866_s25 = smov [#allocation9]  }
  0x1a   : > { %s303_s26 = sshll.u32 %s1866_s25, 4  ;;  %s1867_s27 = smov [#allocation10]   ;;  %s1999_s26 = int_to_ptr.vmem [resolvable:$true] %s303_s26 }
  0x1b   : > { %p1995_p11 = pnand %p1540_p9, %p1964_p1  ;;  %s2001_s28 = sshll.u32 %s1867_s27, 4  ;;  %s326_s28 = int_to_ptr.vmem [resolvable:$true] %s2001_s28 }
  0x1c   : > { %s1659_s16 = scalar_lea.hbm %s2328_s1, 256 }
  0x1d   : > { %p1660_p12 = scmp.ne.s32.totalorder %s2328_s1, %s1659_s16  ;;  %p2011_p13 = pneg %p1995_p11 }
  0x1e   : > { %p1666_p5 = scmp.lt.u32.totalorder %s1659_s16, %s2328_s1 }
  0x1f   : > { %p1662_p0 = pnand %p2011_p13, %p1660_p12 }
  0x21   : > { %p1663_p3 = pneg %p1662_p0 }
  0x23   : > { %p1668_p7 = pnand %p1666_p5, %p1663_p3 }
  0x25   : > { %1671 = shalt.err (!%p1668_p7)
}
  0x26   : > { %s1672_s20 = scalar_lea.vmem %s1988_s23, 256  ;;  %p1680_p1 = scmp.lt.s32.totalorder %s1988_s23, %s1988_s23 }
  0x27   : > { %p1673_p9 = scmp.ne.s32.totalorder %s1988_s23, %s1672_s20  ;;  %p1681_p4 = scmp.lt.s32.totalorder %s1672_s20, %s1672_s20 }
  0x29   : > { %p1675_p10 = pnand %p1673_p9, %p2011_p13  ;;  %p1682_p12 = por %p1681_p4, %p1680_p1 }
  0x2b   : > { %p1676_p6 = pneg %p1675_p10 }
  0x2d   : > { %p1683_p0 = pnand %p1682_p12, %p1676_p6 }
  0x2f   : > { %1686 = shalt.err (!%p1683_p0)
}
  0x30   : > { %s1868_s29 = smov 64   ;;  %s1869_s15 = smov 4  }
  0x31   : > { %1543 = dma.hbm_to_vmem [thread:$0]  (!%p1995_p11), %s2328_s1, 256, %s1988_s23, [#allocation8], %s1868_s29, %s1868_s29, %s1869_s15  }
  0x32   : > { %s1687_s20 = scalar_lea.hbm %s2330_s3, 256 }
  0x33   : > { %p1688_p1 = scmp.ne.s32.totalorder %s2330_s3, %s1687_s20  ;;  %p1694_p10 = scmp.lt.u32.totalorder %s1687_s20, %s2330_s3 }
  0x35   : > { %p1690_p4 = pnand %p1688_p1, %p2011_p13 }
  0x37   : > { %p1691_p6 = pneg %p1690_p4 }
  0x39   : > { %p1696_p3 = pnand %p1694_p10, %p1691_p6 }
  0x3b   : > { %1699 = shalt.err (!%p1696_p3)
}
  0x3c   : > { %s1700_s23 = scalar_lea.vmem %s1999_s26, 256  ;;  %p1708_p12 = scmp.lt.s32.totalorder %s1999_s26, %s1999_s26 }
  0x3d   : > { %p1701_p5 = scmp.ne.s32.totalorder %s1999_s26, %s1700_s23  ;;  %p1709_p0 = scmp.lt.s32.totalorder %s1700_s23, %s1700_s23 }
  0x3f   : > { %p1703_p7 = pnand %p1701_p5, %p2011_p13  ;;  %p1710_p1 = por %p1709_p0, %p1708_p12 }
  0x41   : > { %p1704_p9 = pneg %p1703_p7 }
  0x43   : > { %p1711_p4 = pnand %p1710_p1, %p1704_p9 }
  0x45   : > { %1714 = shalt.err (!%p1711_p4)
}
  0x46   : > { %1546 = dma.hbm_to_vmem [thread:$0]  (!%p1995_p11), %s2330_s3, 256, %s1999_s26, [#allocation8], %s1868_s29, %s1868_s29, %s1869_s15  }
  0x47   : > { %s1715_s16 = scalar_lea.hbm %s2334_s7, 256 }
  0x48   : > { %p1716_p6 = scmp.ne.s32.totalorder %s2334_s7, %s1715_s16  ;;  %p1722_p5 = scmp.lt.u32.totalorder %s1715_s16, %s2334_s7 }
  0x4a   : > { %p1718_p10 = pnand %p1716_p6, %p2011_p13 }
  0x4c   : > { %p1719_p3 = pneg %p1718_p10 }
  0x4e   : > { %p1724_p7 = pnand %p1722_p5, %p1719_p3 }
  0x50   : > { %1727 = shalt.err (!%p1724_p7)
}
  0x51   : > { %s1728_s23 = scalar_lea.vmem %s326_s28, 256  ;;  %p1736_p1 = scmp.lt.s32.totalorder %s326_s28, %s326_s28 }
  0x52   : > { %p1729_p9 = scmp.ne.s32.totalorder %s326_s28, %s1728_s23  ;;  %p1737_p4 = scmp.lt.s32.totalorder %s1728_s23, %s1728_s23 }
  0x54   : > { %p1731_p12 = pnand %p1729_p9, %p2011_p13  ;;  %p1738_p8 = por %p1737_p4, %p1736_p1 }
  0x56   : > { %p1732_p0 = pneg %p1731_p12 }
  0x58   : > { %p1739_p2 = pnand %p1738_p8, %p1732_p0 }
  0x5a   : > { %1742 = shalt.err (!%p1739_p2)
}
  0x5b   : > { %1549 = dma.hbm_to_vmem [thread:$0]  (!%p1995_p11), %s2334_s7, 256, %s326_s28, [#allocation11], %s1868_s29, %s1868_s29, %s1869_s15  }
  0x5c   : > { %s53_s30 = sadd.s32 1, %s1851_s11  ;;  %s46_s24 = sadd.s32 1, %s1859_s13 }
  0x5d   : > { %p60_p2 = scmp.ne.s32.totalorder %s1851_s11, %s1847_s10  ;;  %p48_p8 = scmp.ge.s32.totalorder %s46_s24, 2 }
  0x5e   : > { %p61_p13 = scmp.eq.s32.totalorder %s1863_s14, 0  ;;  %p2357_p6 = scmp.ne.s32.totalorder %s2350_s18, 0 }
  0x5f   : > { %p1561_p3 = scmp.lt.s32.totalorder %s1863_s14, 2  ;;  %s2377_s24 = smov (%p48_p8, %s46_s24), 0 }
  0x60   : > { %p2090_p10 = por %p2357_p6, %p60_p2  ;;  %p62_p5 = por %p61_p13, %p60_p2 }
  0x61   : > { %s342_s9 = sand.u32 1, %s1851_s11   ;;  %s50_s12 = ssub.s32 %s1859_s13, %s2377_s24 }
  0x62   : > { %p51_p7 = scmp.eq.s32.totalorder %s50_s12, 0  ;;  %s1376_s28 = sshll.u32 %s342_s9, 2 }
  0x63   : > { %s1377_s29 = sshll.u32 %s1859_s13, 6  ;;  %s346_s25 = scalar_lea.vmem [#allocation4], %s1376_s28 }
  0x64   : > { %s2102_s15 = scalar_select %p51_p7, %s1851_s11, %s53_s30  }
  0x65   : > { %s2107_s18 = scalar_lea.hbm %s2327_s0, %s1377_s29  ;;  %s353_s27 = sshll.u32 %s346_s25, 4  ;;  %s2109_s27 = int_to_ptr.vmem [resolvable:$true] %s353_s27 }
  0x66   : > { %p2113_p11 = pnand %p1561_p3, %p62_p5  ;;  %s343_s23 = scalar_lea.sflag [#allocation5], %s342_s9 }
  0x67   : > { %s1743_s26 = scalar_lea.hbm %s2107_s18, 64  ;;  %s1748_s12 = scalar_lea.hbm %s2327_s0, 128 }
  0x68   : > { %p1744_p9 = scmp.ne.s32.totalorder %s2107_s18, %s1743_s26  ;;  %p1745_p12 = pneg %p2113_p11 }
  0x69   : > { %p1749_p4 = scmp.lt.u32.totalorder %s2107_s18, %s2327_s0  ;;  %p1750_p2 = scmp.lt.u32.totalorder %s1748_s12, %s1743_s26 }
  0x6a   : > { %p1746_p0 = pnand %p1745_p12, %p1744_p9  ;;  %p1752_p13 = scmp.lt.u32.totalorder %s1743_s26, %s2107_s18 }
  0x6b   : > { %p1751_p8 = por %p1750_p2, %p1749_p4 }
  0x6c   : > { %p1747_p1 = pneg %p1746_p0 }
  0x6d   : > { %p1753_p6 = por %p1752_p13, %p1751_p8 }
  0x6f   : > { %p1754_p3 = pnand %p1753_p6, %p1747_p1 }
  0x71   : > { %1757 = shalt.err (!%p1754_p3)
}
  0x72   : > { %s1758_s9 = scalar_lea.vmem %s2109_s27, 64  ;;  %s1870_s16 = smov [#allocation4]  }
  0x73   : > { %p1759_p5 = scmp.ne.s32.totalorder %s2109_s27, %s1758_s9  ;;  %s1763_s22 = sshll.u32 %s1870_s16, 4  ;;  %s1764_s22 = int_to_ptr.vmem [resolvable:$false] %s1763_s22 }
  0x74   : > { %s1765_s25 = scalar_lea.vmem %s1764_s22, 128  ;;  %p1766_p0 = scmp.lt.s32.totalorder %s2109_s27, %s1764_s22 }
  0x75   : > { %p1761_p7 = pnand %p1759_p5, %p1745_p12  ;;  %p1767_p4 = scmp.lt.s32.totalorder %s1765_s25, %s1758_s9 }
  0x77   : > { %p1762_p9 = pneg %p1761_p7  ;;  %p1768_p2 = por %p1767_p4, %p1766_p0 }
  0x79   : > { %p1769_p8 = pnand %p1768_p2, %p1762_p9 }
  0x7b   : > { %1772 = shalt.err (!%p1769_p8)
}
  0x7c   : > { %1553 = dma.hbm_to_vmem [thread:$0]  (!%p2113_p11), %s2107_s18, 64, %s2109_s27, %s343_s23  }
  0x7d   : > { %p2360_p1 = scmp.ne.s32.totalorder %s2354_s21, 0 }
  0x7e   : > { %s2145_s26 = sand.u32 (!%p2360_p1), 1, %s1847_s10   ;;  %p2361_p12 = scmp.ne.s32.totalorder (!%p2360_p1), %s2351_s19, 0 }
  0x7f   : > { %362 = sbr.rel (%p2360_p1) target bundleno = 1448 (0x5a8), region = 56  ;;  %s1379_s6 = sshll.u32 (!%p2360_p1), %s2145_s26, 2 }
  0x80   : > { %s365_s30 = scalar_lea.sflag (!%p2360_p1), [#allocation5], %s2145_s26  ;;  %s368_s12 = scalar_lea.vmem (!%p2360_p1), [#allocation4], %s1379_s6 }
  0x86   : > { %1826 = dma.done.wait (%p2361_p12), %s365_s30, 64  }
  0x87   : > { %1828 = vsyncadd (%p2361_p12), %s365_s30, 4294967232  ;;  %p2362_p13 = scmp.ne.s32.totalorder %s2349_s17, 0 }
  0x89   : > { %1830 = dma.done.wait (%p2362_p13), [#allocation8], 512  }
  0x8a   : > { %1832 = vsyncadd (%p2362_p13), [#allocation8], 4294966784 }
  0x8b   : > { %1834 = dma.done.wait (%p2362_p13), [#allocation11], 256  }
  0x8c   : > { %1836 = vsyncadd (%p2362_p13), [#allocation11], 4294967040  ;;  %v1871_v0 = vmov 0.0   ;;  %vm1872_vm0 = vmmov 0   ;;  %v1627_v1 = vld [vmem:[#allocation9] sm:$0xff]   ;;  %v1628_v2 = vld [vmem:[#allocation9 + $0x8] sm:$0xff]  }
  0x8d   : > { %1444 = vmatprep.subr.bf16.mxu0 %v1871_v0  ;;  %1448 = vmatprep.mubr.msk.bf16.mxu0 %vm1872_vm0, %v1871_v0  ;;  %v421_v3 = vld [vmem:[%s368_s12] sm:$0xf]  ;;  %vm445_vm1 = vcmask 261120   ;;  %v1629_v4 = vld [vmem:[#allocation7] sm:$0xff]   ;;  %v1630_v5 = vld [vmem:[#allocation7 + $0x8] sm:$0xff]   ;;  %vm554_vm2 = vcmask 60416  }
  0x8e   : > { %1452 = vmatprep.subr.bf16.mxu1 %v1871_v0  ;;  %1456 = vmatprep.mubr.msk.bf16.mxu1 %vm1872_vm0, %v1871_v0  ;;  %v2173_v6 = vld [vmem:[%s368_s12] sm:$0xf]  ;;  %v1631_v7 = vld [vmem:[%s2332_s5] sm:$0xff]   ;;  %v1632_v8 = vld [vmem:[%s2332_s5 + $0x8] sm:$0xff]   ;;  %s1873_s23 = smov 104   ;;  %s1874_s28 = smov 120  }
  0x8f   : > { %1445 = vmatpush3.bf16.msra.mxu0 %v1627_v1  ;;  %1453 = vmatpush3.bf16.msra.mxu1 %v1631_v7  ;;  %v1384_v9 = vld [vmem:[%s2331_s4] ss:$0 sm:$0xff]  ;;  %s1875_s16 = smov 112   ;;  %vm698_vm3 = vcmask 64512   ;;  %s2363_s6 = sld [smem:[#allocation20_spill]]  ;;  %vm950_vm4 = vcmask 1043456  }
  0x90   : > { %1446 = vmatprep.subr.bf16.mxu0 %v1871_v0  ;;  %1454 = vmatprep.subr.bf16.mxu1 %v1871_v0  ;;  %v1394_v16 = vld [vmem:[%s2329_s2] ss:$0 sm:$0xff]  ;;  %s1876_s30 = smov 8   ;;  %s1877_s12 = smov 16   ;;  %vm1158_vm5 = vcmask 130048   ;;  %vm1160_vm6 = vcmask 195584  }
  0x91   : > { %s1878_s17 = smov 24   ;;  %s2364_s19 = sld [smem:[#allocation18_spill]] }
  0x92   : > { %s1383_s21 = sshll.u32 %s2145_s26, 3  ;;  %s2365_s20 = sld [smem:[#allocation21_spill]] }
  0x93   : > { %1447 = vmatpush3.bf16.msra.mxu0 %v1628_v2  ;;  %1455 = vmatpush3.bf16.msra.mxu1 %v1632_v8  ;;  %s2366_s22 = sld [smem:[#allocation22_spill]] }
  0x94   : > { %1460 = vmatprep.subr.bf16.mxu0 %v1871_v0  ;;  %1468 = vmatprep.subr.bf16.mxu1 %v1871_v0 }
  0x95   : > { %v1388_v25 = vld [vmem:[%s2363_s6] ss:$0 sm:$0xff]  ;;  %s1234_s6 = scalar_lea.sflag [#allocation6], %s2145_s26 }
  0x96   : > { %1449 = vmatmul.mubr.msk.bf16.vlgmr.msra.gmra.mrb[0].mxu0 %vm445_vm1, %v421_v3  ;;  %1457 = vmatmul.mubr.msk.bf16.vlgmr.msra.gmra.mrb[0].mxu1 %vm445_vm1, %v421_v3 }
  0x97   : > { %1461 = vmatpush3.bf16.msra.mxu0 %v1629_v4  ;;  %1464 = vmatprep.mubr.msk.bf16.mxu0 %vm1872_vm0, %v1871_v0 }
  0x98   : > { %1462 = vmatprep.subr.bf16.mxu0 %v1871_v0  ;;  %1470 = vmatprep.mubr.msk.bf16.mxu1 %vm1872_vm0, %v1871_v0 }
  0x9b   : > { %1463 = vmatpush3.bf16.msra.mxu0 %v1630_v5 }
  0x9c   : > { %1474 = vmatprep.subr.bf16.mxu0 %v1871_v0 }
  0x9e   : > { %1465 = vmatmul.mubr.msk.bf16.vlgmr.msra.gmra.mrb[4].mxu0 %vm445_vm1, %v2173_v6 }
  0x9f   : > { %1476 = vmatprep.mubr.msk.bf16.mxu0 %vm1872_vm0, %v1871_v0 }
 0x169   : > { %v483_v10 = vpop.f32.mrb[0].mxu0  ;;  %v547_v26 = vpop.f32.mrb[0].mxu1 }
 0x16a   : > { %v484_v11 = vadd.f32 %v1384_v9, %v483_v10  ;;  %v1450_v12 = vpop.f32.mrb[1].mxu0  ;;  %v548_v27 = vadd.f32 %v1388_v25, %v547_v26  ;;  %v1458_v28 = vpop.f32.mrb[1].mxu1 }
 0x16b   : > { %v486_v13 = vpop.f32.mrb[2].mxu0  ;;  %v550_v29 = vpop.f32.mrb[2].mxu1 }
 0x16c   : > { %v489_v14 = vpack.c.bf16 %v484_v11, %v484_v11  ;;  %v1451_v15 = vpop.f32.mrb[3].mxu0  ;;  %v2210_v30 = vpack.c.bf16 %v548_v27, %v548_v27  ;;  %v1459_v31 = vpop.f32.mrb[3].mxu1 }
 0x16e   : > { %555 = vst.msk [vmem:[#allocation2] sm:$0xf] %vm554_vm2, %v489_v14  ;;  %589 = vrot.lane.b32.xlu1 %v489_v14, %s1873_s23  ;;  %560 = vrot.lane.b32.xlu0 %v489_v14, %s1874_s28  ;;  %556 = vst.msk [vmem:[#allocation3] sm:$0xf] %vm554_vm2, %v2210_v30 }
 0x171   : > { %v670_v17 = vpop.f32.mrb[4].mxu0 }
 0x172   : > { %576 = vrot.lane.b32.xlu0 %v489_v14, %s1875_s16  ;;  %v671_v18 = vadd.f32 %v1394_v16, %v670_v17  ;;  %v1466_v19 = vpop.f32.mrb[5].mxu0 }
 0x173   : > { %v673_v20 = vpop.f32.mrb[6].mxu0 }
 0x174   : > { %677 = vrot.lane.b32.xlu1 %v671_v18, %s1874_s28  ;;  %v1467_v21 = vpop.f32.mrb[7].mxu0  ;;  %v686_v24 = vpack.c.bf16 %v671_v18, %v671_v18 }
 0x175   : > { %v690_v22 = vld [vmem:[#allocation2] sm:$0xf]  ;;  %v694_v43 = vld [vmem:[#allocation3] sm:$0xf] }
 0x176   : > { %v703_v23 = vsel %vm698_vm3, %v690_v22, 0  ;;  %680 = vrot.lane.b32.xlu0 %v671_v18, %s1875_s16  ;;  %v952_v46 = vsel %vm950_vm4, %v694_v43, 0 }
 0x177   : > { %1469 = vmatpush3.bf16.xpose.msra.mxu1 %v703_v23 }
 0x178   : > { %683 = vrot.lane.b32.xlu1 %v671_v18, %s1873_s23  ;;  %1480 = vmatprep.subr.bf16.mxu1 %v1871_v0 }
 0x17c   : > { %570 = vrot.lane.b32.xlu1 %v2210_v30, %s1874_s28  ;;  %s414_s28 = scalar_lea.vmem [#allocation12], %s1383_s21 }
 0x17d   : > { %s1249_s29 = sshll.u32 %s414_s28, 4  ;;  %s2279_s29 = int_to_ptr.vmem [resolvable:$true] %s1249_s29 }
 0x17e   : > { %1471 = vmatmul.mubr.msk.bf16.vlgmr.msra.gmra.mrb[4].mxu1 %vm698_vm3, %v686_v24 }
 0x17f   : > { %1482 = vmatprep.mubr.msk.bf16.mxu1 %vm1872_vm0, %v1871_v0 }
 0x1e0   : > { %v590_v32 = vpop.permute.xlu1 %589  ;;  %v561_v33 = vpop.permute.xlu0 %560 }
 0x1e1   : > { %595 = vst.msk [vmem:[#allocation2 + $0xc] sm:$0xf] %vm554_vm2, %v590_v32  ;;  %566 = vst.msk [vmem:[#allocation2 + $0x4] sm:$0xf] %vm554_vm2, %v561_v33 }
 0x1e4   : > { %v577_v34 = vpop.permute.xlu0 %576 }
 0x1e5   : > { %582 = vst.msk [vmem:[#allocation2 + $0x8] sm:$0xf] %vm554_vm2, %v577_v34 }
 0x1e6   : > { %v678_v37 = vpop.permute.xlu1 %677 }
 0x1e7   : > { %v687_v39 = vpack.c.bf16 %v678_v37, %v678_v37 }
 0x1e8   : > { %v691_v35 = vld [vmem:[#allocation2 + $0x4] sm:$0xf]  ;;  %v693_v41 = vld [vmem:[#allocation2 + $0xc] sm:$0xf]  ;;  %v681_v42 = vpop.permute.xlu0 %680 }
 0x1e9   : > { %v749_v36 = vsel %vm698_vm3, %v691_v35, 0  ;;  %v841_v44 = vsel %vm698_vm3, %v693_v41, 0  ;;  %v688_v45 = vpack.c.bf16 %v681_v42, %v681_v42 }
 0x1ea   : > { %1475 = vmatpush3.bf16.xpose.msra.mxu0 %v749_v36  ;;  %v684_v47 = vpop.permute.xlu1 %683 }
 0x1eb   : > { %1486 = vmatprep.subr.bf16.mxu0 %v1871_v0  ;;  %v689_v48 = vpack.c.bf16 %v684_v47, %v684_v47 }
 0x1ec   : > { %v692_v38 = vld [vmem:[#allocation2 + $0x8] sm:$0xf] }
 0x1ed   : > { %v795_v40 = vsel %vm698_vm3, %v692_v38, 0 }
 0x1ee   : > { %1481 = vmatpush3.bf16.xpose.msra.mxu1 %v795_v40  ;;  %v571_v54 = vpop.permute.xlu1 %570 }
 0x1ef   : > { %1492 = vmatprep.subr.bf16.mxu1 %v1871_v0  ;;  %575 = vst.msk [vmem:[#allocation3 + $0x4] sm:$0xf] %vm554_vm2, %v571_v54 }
 0x1f1   : > { %1477 = vmatmul.mubr.msk.bf16.vlgmr.msra.gmra.mrb[8].mxu0 %vm698_vm3, %v687_v39 }
 0x1f2   : > { %1487 = vmatpush3.bf16.xpose.msra.mxu0 %v841_v44  ;;  %1488 = vmatprep.mubr.msk.bf16.mxu0 %vm1872_vm0, %v1871_v0 }
 0x1f3   : > { %1498 = vmatprep.subr.bf16.mxu0 %v1871_v0 }
 0x1f5   : > { %1483 = vmatmul.mubr.msk.bf16.vlgmr.msra.gmra.mrb[8].mxu1 %vm698_vm3, %v688_v45 }
 0x1f6   : > { %1493 = vmatpush3.bf16.msra.mxu1 %v952_v46  ;;  %1494 = vmatprep.mubr.msk.bf16.mxu1 %vm1872_vm0, %v1871_v0  ;;  %v695_v55 = vld [vmem:[#allocation3 + $0x4] sm:$0xf] }
 0x1f7   : > { %1504 = vmatprep.subr.bf16.mxu1 %v1871_v0  ;;  %v998_v56 = vsel %vm950_vm4, %v695_v55, 0 }
 0x1f9   : > { %1489 = vmatmul.mubr.msk.bf16.vlgmr.msra.gmra.mrb[12].mxu0 %vm698_vm3, %v689_v48 }
 0x1fa   : > { %1500 = vmatprep.mubr.msk.bf16.mxu0 %vm1872_vm0, %v1871_v0  ;;  %1499 = vmatpush3.bf16.msra.mxu0 %v998_v56 }
 0x1fb   : > { %1510 = vmatprep.subr.bf16.mxu0 %v1871_v0 }
 0x251   : > { %v739_v49 = vpop.f32.mrb[4].mxu1 }
 0x252   : > { %v1472_v50 = vpop.f32.mrb[5].mxu1  ;;  %v883_v51 = vsel %vm698_vm3, %v739_v49, -inf }
 0x253   : > { %884 = vmax.xlane.f32.xlu0 %v883_v51  ;;  %v742_v52 = vpop.f32.mrb[6].mxu1 }
 0x254   : > { %v1473_v53 = vpop.f32.mrb[7].mxu1 }
 0x2c4   : > { %v785_v57 = vpop.f32.mrb[8].mxu0 }
 0x2c5   : > { %v1478_v58 = vpop.f32.mrb[9].mxu0  ;;  %v886_v59 = vsel %vm698_vm3, %v785_v57, -inf }
 0x2c6   : > { %887 = vmax.xlane.f32.xlu1 %v886_v59  ;;  %v788_v60 = vpop.f32.mrb[10].mxu0 }
 0x2c7   : > { %v1479_v61 = vpop.f32.mrb[11].mxu0 }
 0x2c8   : > { %v831_v62 = vpop.f32.mrb[8].mxu1 }
 0x2c9   : > { %v1484_v63 = vpop.f32.mrb[9].mxu1  ;;  %v889_v1 = vsel %vm698_vm3, %v831_v62, -inf }
 0x2ca   : > { %890 = vmax.xlane.f32.xlu0 %v889_v1  ;;  %v834_v2 = vpop.f32.mrb[10].mxu1 }
 0x2cb   : > { %v1485_v3 = vpop.f32.mrb[11].mxu1 }
 0x2cc   : > { %v877_v4 = vpop.f32.mrb[12].mxu0 }
 0x2cd   : > { %v1490_v5 = vpop.f32.mrb[13].mxu0  ;;  %v892_v7 = vsel %vm698_vm3, %v877_v4, -inf }
 0x2ce   : > { %893 = vmax.xlane.f32.xlu0 %v892_v7  ;;  %v880_v8 = vpop.f32.mrb[14].mxu0 }
 0x2cf   : > { %v1491_v9 = vpop.f32.mrb[15].mxu0 }
 0x2d7   : > { %596 = vrot.lane.b32.xlu1 %v2210_v30, %s1873_s23  ;;  %s1411_s23 = sshll.u32 %s2364_s19, 7 }
 0x2d8   : > { %s2277_s25 = scalar_lea.hbm %s2366_s22, %s1411_s23 }
 0x2e0   : > { %v885_v10 = vpop.xlane.xlu0 %884 }
 0x2e1   : > { %v895_v11 = vmax.f32 %v885_v10, -1e+30 }
 0x2e3   : > { %v911_v12 = vsub.f32 %v739_v49, %v895_v11  ;;  %v899_v44 = vsub.f32 -1e+30, %v895_v11 }
 0x2e4   : > { %583 = vrot.lane.b32.xlu0 %v2210_v30, %s1875_s16 }
 0x2e5   : > { %v915_v13 = vmul.f32 1.442695, %v911_v12  ;;  %v903_v45 = vmul.f32 1.442695, %v899_v44  ;;  %v1406_v44 = vld [vmem:[%s2365_s20] ss:$0 sm:$0xff] }
 0x2e7   : > { %1635 = vpow2.f32 %v915_v13  ;;  %v1633_v13 = vld [vmem:[#allocation10] sm:$0xff]  }
 0x2f1   : > { %v1636_v14 = vpop.eup %1635 }
 0x2f2   : > { %v943_v15 = vpack.c.bf16 %v1636_v14, %v1636_v14  ;;  %v927_v38 = vsel %vm698_vm3, %v1636_v14, 0.0 }
 0x2f4   : > { %1495 = vmatmul.mubr.msk.bf16.vlgmr.msra.gmra.mrb[12].mxu1 %vm698_vm3, %v943_v15 }
 0x2f5   : > { %1506 = vmatprep.mubr.msk.bf16.mxu1 %vm1872_vm0, %v1871_v0 }
 0x353   : > { %v888_v16 = vpop.xlane.xlu1 %887 }
 0x354   : > { %v896_v17 = vmax.f32 %v888_v16, -1e+30 }
 0x356   : > { %v912_v18 = vsub.f32 %v785_v57, %v896_v17  ;;  %v900_v58 = vsub.f32 -1e+30, %v896_v17 }
 0x357   : > { %v891_v19 = vpop.xlane.xlu0 %890  ;;  %v597_v20 = vpop.permute.xlu1 %596 }
 0x358   : > { %v917_v21 = vmul.f32 1.442695, %v912_v18  ;;  %v897_v22 = vmax.f32 %v891_v19, -1e+30  ;;  %601 = vst.msk [vmem:[#allocation3 + $0xc] sm:$0xf] %vm554_vm2, %v597_v20 }
 0x359   : > { %v905_v59 = vmul.f32 1.442695, %v900_v58  ;;  %v1634_v19 = vld [vmem:[#allocation10 + $0x8] sm:$0xff]  }
 0x35a   : > { %v913_v23 = vsub.f32 %v831_v62, %v897_v22  ;;  %1637 = vpow2.f32 %v917_v21  ;;  %v901_v60 = vsub.f32 -1e+30, %v897_v22 }
 0x35b   : > { %v894_v24 = vpop.xlane.xlu0 %893 }
 0x35c   : > { %v919_v25 = vmul.f32 1.442695, %v913_v23  ;;  %v898_v26 = vmax.f32 %v894_v24, -1e+30  ;;  %v907_v61 = vmul.f32 1.442695, %v901_v60 }
 0x35e   : > { %v914_v27 = vsub.f32 %v877_v4, %v898_v26  ;;  %1639 = vpow2.f32 %v919_v25  ;;  %v902_v62 = vsub.f32 -1e+30, %v898_v26 }
 0x35f   : > { %v584_v28 = vpop.permute.xlu0 %583  ;;  %v697_v31 = vld [vmem:[#allocation3 + $0xc] sm:$0xf] }
 0x360   : > { %v921_v29 = vmul.f32 1.442695, %v914_v27  ;;  %588 = vst.msk [vmem:[#allocation3 + $0x8] sm:$0xf] %vm554_vm2, %v584_v28  ;;  %v1090_v35 = vsel %vm950_vm4, %v697_v31, 0 }
 0x361   : > { %v909_v63 = vmul.f32 1.442695, %v902_v62 }
 0x362   : > { %1641 = vpow2.f32 %v921_v29 }
 0x363   : > { %1643 = vpow2.f32 %v903_v45 }
 0x364   : > { %v1638_v30 = vpop.eup %1637 }
 0x365   : > { %v930_v32 = vsel %vm698_vm3, %v1638_v30, 0.0  ;;  %v944_v33 = vpack.c.bf16 %v1638_v30, %v1638_v30 }
 0x366   : > { %931 = vadd.xlane.f32.xlu1 %v930_v32 }
 0x367   : > { %v696_v34 = vld [vmem:[#allocation3 + $0x8] sm:$0xf]  ;;  %1501 = vmatmul.mubr.msk.bf16.vlgmr.msra.gmra.mrb[16].mxu0 %vm698_vm3, %v944_v33 }
 0x368   : > { %v1044_v36 = vsel %vm950_vm4, %v696_v34, 0  ;;  %v1640_v37 = vpop.eup %1639  ;;  %1511 = vmatpush3.bf16.msra.mxu0 %v1090_v35  ;;  %1512 = vmatprep.mubr.msk.bf16.mxu0 %vm1872_vm0, %v1871_v0 }
 0x369   : > { %1505 = vmatpush3.bf16.msra.mxu1 %v1044_v36  ;;  %v933_v39 = vsel %vm698_vm3, %v1640_v37, 0.0  ;;  %v945_v40 = vpack.c.bf16 %v1640_v37, %v1640_v37  ;;  %v1144_v37 = vunpack.c.l.bf16 %v2173_v6 }
 0x36a   : > { %1516 = vmatprep.subr.bf16.mxu1 %v1871_v0  ;;  %928 = vadd.xlane.f32.xlu1 %v927_v38 }
 0x36b   : > { %934 = vadd.xlane.f32.xlu0 %v933_v39 }
 0x36c   : > { %1507 = vmatmul.mubr.msk.bf16.vlgmr.msra.gmra.mrb[16].mxu1 %vm698_vm3, %v945_v40  ;;  %v1642_v41 = vpop.eup %1641 }
 0x36d   : > { %1520 = vmatprep.mubr.msk.bf16.mxu1 %vm1872_vm0, %v1871_v0  ;;  %v936_v42 = vsel %vm698_vm3, %v1642_v41, 0.0  ;;  %v946_v43 = vpack.c.bf16 %v1642_v41, %v1642_v41  ;;  %v1644_v46 = vpop.eup %1643  ;;  %1517 = vmatpush3.bf16.msra.mxu1 %v1633_v13 }
 0x36e   : > { %v923_v47 = vmul.f32 0.0, %v1644_v46  ;;  %1518 = vmatprep.subr.bf16.mxu1 %v1871_v0 }
 0x36f   : > { %937 = vadd.xlane.f32.xlu0 %v936_v42  ;;  %1513 = vmatmul.mubr.msk.bf16.vlgmr.msra.gmra.mrb[20].mxu0 %vm698_vm3, %v946_v43 }
 0x371   : > { %1519 = vmatpush3.bf16.msra.mxu1 %v1634_v19 }
 0x3c7   : > { %v988_v48 = vpop.f32.mrb[12].mxu1 }
 0x3c8   : > { %v1132_v49 = vadd.f32 %v988_v48, %v923_v47  ;;  %v1496_v50 = vpop.f32.mrb[13].mxu1 }
 0x3c9   : > { %v991_v51 = vpop.f32.mrb[14].mxu1 }
 0x3ca   : > { %v1497_v52 = vpop.f32.mrb[15].mxu1 }
 0x3f3   : > { %v932_v53 = vpop.xlane.xlu1 %931 }
 0x3f7   : > { %v929_v54 = vpop.xlane.xlu1 %928 }
 0x3f8   : > { %v939_v55 = vadd.f32 %v929_v54, %v923_v47  ;;  %v935_v4 = vpop.xlane.xlu0 %934 }
 0x3fa   : > { %1645 = vrcp.f32 %v939_v55 }
 0x3fb   : > { %1647 = vpow2.f32 %v905_v59 }
 0x3fc   : > { %1649 = vpow2.f32 %v907_v61  ;;  %v938_v10 = vpop.xlane.xlu0 %937 }
 0x3fd   : > { %1651 = vpow2.f32 %v909_v63 }
 0x404   : > { %v1646_v56 = vpop.eup %1645 }
 0x405   : > { %v1140_v57 = vmul.f32 %v1646_v56, %v1132_v49  ;;  %v1648_v1 = vpop.eup %1647 }
 0x406   : > { %v924_v2 = vmul.f32 0.0, %v1648_v1  ;;  %v1650_v3 = vpop.eup %1649 }
 0x407   : > { %v925_v7 = vmul.f32 0.0, %v1650_v3  ;;  %v1652_v8 = vpop.eup %1651 }
 0x408   : > { %v940_v5 = vadd.f32 %v932_v53, %v924_v2  ;;  %v926_v11 = vmul.f32 0.0, %v1652_v8 }
 0x409   : > { %v941_v9 = vadd.f32 %v935_v4, %v925_v7 }
 0x40a   : > { %1653 = vrcp.f32 %v940_v5  ;;  %v942_v12 = vadd.f32 %v938_v10, %v926_v11 }
 0x40b   : > { %1655 = vrcp.f32 %v941_v9 }
 0x40c   : > { %1657 = vrcp.f32 %v942_v12 }
 0x414   : > { %v1654_v17 = vpop.eup %1653 }
 0x415   : > { %v1656_v25 = vpop.eup %1655 }
 0x416   : > { %v1658_v31 = vpop.eup %1657 }
 0x43a   : > { %v1034_v14 = vpop.f32.mrb[16].mxu0 }
 0x43b   : > { %v1133_v15 = vadd.f32 %v1034_v14, %v924_v2  ;;  %v1502_v16 = vpop.f32.mrb[17].mxu0 }
 0x43c   : > { %v1037_v18 = vpop.f32.mrb[18].mxu0 }
 0x43d   : > { %v1141_v20 = vmul.f32 %v1654_v17, %v1133_v15  ;;  %v1503_v21 = vpop.f32.mrb[19].mxu0 }
 0x43f   : > { %v1080_v22 = vpop.f32.mrb[16].mxu1  ;;  %1146 = vrot.lane.b32.xlu0 %v1141_v20, %s1876_s30  ;;  %s1773_s30 = scalar_lea.vmem %s2279_s29, 128 }
 0x440   : > { %v1134_v23 = vadd.f32 %v1080_v22, %v925_v7  ;;  %v1508_v24 = vpop.f32.mrb[17].mxu1  ;;  %p1774_p11 = scmp.ne.s32.totalorder %s2279_s29, %s1773_s30 }
 0x441   : > { %v1083_v26 = vpop.f32.mrb[18].mxu1 }
 0x442   : > { %v1142_v27 = vmul.f32 %v1656_v25, %v1134_v23  ;;  %v1509_v28 = vpop.f32.mrb[19].mxu1  ;;  %v1126_v0 = vpop.f32.mrb[20].mxu0  ;;  %p1775_p6 = pnand %p1774_p11, %p2090_p10 }
 0x443   : > { %v1135_v29 = vadd.f32 %v1126_v0, %v926_v11  ;;  %v1514_v30 = vpop.f32.mrb[21].mxu0 }
 0x444   : > { %1150 = vrot.lane.b32.xlu1 %v1142_v27, %s1877_s12  ;;  %v1129_v32 = vpop.f32.mrb[22].mxu0  ;;  %p1776_p3 = pneg %p1775_p6  ;;  %s1879_s12 = smov [#allocation12]  }
 0x445   : > { %v1143_v33 = vmul.f32 %v1658_v31, %v1135_v29  ;;  %v1515_v34 = vpop.f32.mrb[23].mxu0 }
 0x448   : > { %1154 = vrot.lane.b32.xlu1 %v1143_v33, %s1878_s17  ;;  %s1777_s17 = sshll.u32 %s1879_s12, 4  ;;  %s1778_s17 = int_to_ptr.vmem [resolvable:$false] %s1777_s17 }
 0x449   : > { %s1779_s19 = scalar_lea.vmem %s1778_s17, 256  ;;  %p1780_p5 = scmp.lt.s32.totalorder %s2279_s29, %s1778_s17 }
 0x44a   : > { %p1781_p7 = scmp.lt.s32.totalorder %s1779_s19, %s1773_s30 }
 0x44c   : > { %p1782_p9 = por %p1781_p7, %p1780_p5 }
 0x44e   : > { %p1783_p0 = pnand %p1782_p9, %p1776_p3 }
 0x4b1   : > { %v1147_v35 = vpop.permute.xlu0 %1146 }
 0x4b2   : > { %v1157_v38 = vsel %vm698_vm3, %v1140_v57, %v1147_v35 }
 0x4b6   : > { %v1151_v36 = vpop.permute.xlu1 %1150 }
 0x4b7   : > { %v1159_v39 = vsel %vm1158_vm5, %v1157_v38, %v1151_v36 }
 0x4ba   : > { %v1155_v40 = vpop.permute.xlu1 %1154 }
 0x4bb   : > { %v1161_v41 = vsel %vm1160_vm6, %v1159_v39, %v1155_v40 }
 0x4bc   : > { %v1162_v42 = vadd.f32 %v1161_v41, %v1144_v37 }
 0x4be   : > { %v1163_v43 = vpack.c.bf16 %v1162_v42, %v1162_v42 }
 0x4c0   : > { %1521 = vmatmul.mubr.msk.bf16.vlgmr.msra.gmra.mrb[20].mxu1 %vm445_vm1, %v1163_v43 }
 0x593   : > { %v1224_v45 = vpop.f32.mrb[20].mxu1 }
 0x594   : > { %v1225_v46 = vadd.f32 %v1406_v44, %v1224_v45  ;;  %v1522_v6 = vpop.f32.mrb[21].mxu1 }
 0x595   : > { %v1227_v47 = vpop.f32.mrb[22].mxu1 }
 0x596   : > { %v1230_v48 = vmax.f32 %v1225_v46, 0.0  ;;  %v1523_v49 = vpop.f32.mrb[23].mxu1 }
 0x598   : > { %v1231_v50 = vadd.f32 %v1230_v48, %v1162_v42 }
 0x59a   : > { %1232 = vst.msk [vmem:[%s414_s28] sm:$0xff] %vm445_vm1, %v1231_v50 }
 0x59b   : > { %1786 = shalt.err (!%p1783_p0)
}
 0x59c   : > { %s1787_s26 = scalar_lea.hbm %s2277_s25, 128  ;;  %s1791_s27 = scalar_lea.hbm %s2366_s22, 256 }
 0x59d   : > { %p1788_p4 = scmp.ne.s32.totalorder %s2277_s25, %s1787_s26  ;;  %p1792_p1 = scmp.lt.u32.totalorder %s2277_s25, %s2366_s22 }
 0x59e   : > { %p1793_p12 = scmp.lt.u32.totalorder %s1791_s27, %s1787_s26  ;;  %p1795_p11 = scmp.lt.u32.totalorder %s1787_s26, %s2277_s25 }
 0x59f   : > { %p1789_p2 = pnand %p1788_p4, %p2090_p10 }
 0x5a0   : > { %p1794_p13 = por %p1793_p12, %p1792_p1 }
 0x5a1   : > { %p1790_p8 = pneg %p1789_p2 }
 0x5a2   : > { %p1796_p6 = por %p1795_p11, %p1794_p13 }
 0x5a4   : > { %p1797_p3 = pnand %p1796_p6, %p1790_p8 }
 0x5a6   : > { %1800 = shalt.err (!%p1797_p3)
}
 0x5a7   : > { %1538 = dma.vmem_to_hbm [thread:$0]  (%p2090_p10), %s2279_s29, 128, %s2277_s25, %s1234_s6  }
 0x5a8 PF: > { %s2367_s28 = sld [smem:[#allocation17_spill]]  ;;  %s2368_s9 = sld [smem:[#allocation19_spill]] }
 0x5a9   : > { %p2370_p7 = scmp.ge.s32.totalorder %s1863_s14, 2 }
 0x5ae   : > { %s1261_s16 = sand.u32 1, %s2367_s28   ;;  %p2369_p5 = scmp.ne.s32.totalorder %s2368_s9, 0 }
 0x5af   : > { %s1262_s30 = scalar_lea.sflag [#allocation6], %s1261_s16 }
 0x5b0   : > { %p1555_p9 = pnand %p2370_p7, %p2369_p5 }
 0x5b2   : > { %1838 = dma.done.wait (!%p1555_p9), %s1262_s30, 128  }
 0x5b3   : > { %1840 = vsyncadd (!%p1555_p9), %s1262_s30, 4294967168  ;;  %s27_s14 = sadd.s32 1, %s1863_s14   ;;  %s2371_s30 = smov %s1847_s10 }
 0x5b4   : > { %p24_p0 = scmp.ge.s32.totalorder %s27_s14, 4   ;;  %s2372_s10 = smov %s1851_s11 }
 0x5b5   : > { %s2373_s11 = smov %s2102_s15  ;;  %s2374_s12 = smov %s1859_s13 }
 0x5b6   : > { %s2375_s13 = smov %s2377_s24  ;;  %26 = sbr.rel (!%p24_p0) target bundleno = 12 (0xc), region = 124 }
 0x5bd   :  { %1267 = vsyncpa [#allocation5], 1 }
 0x5be   :  { %1269 = vsyncpa [#allocation5 + $0x1], 1 }
 0x5bf   :  { %1270 = vsyncpa [#allocation8], 1 }
 0x5c0   :  { %1271 = vsyncpa [#allocation11], 1 }
 0x5c1   :  { %1272 = vsyncpa [#allocation6], 1 }
 0x5c2   :  { %1274 = vsyncpa [#allocation6 + $0x1], 1 }

</bundles_post_ra>
